<compile_context>
chip_gen: v7x
topology: tpu7x:2x2x1
jax: 0.10.0
libtpu: 0.0.40
codegen_flags: <defaults>
</compile_context>

<pallas_src>
import functools

import jax
import jax.numpy as jnp
from jax.experimental import pallas as pl
from jax.experimental.pallas import tpu as pltpu

LANE = 128
VMEM_LIMIT = 48 * 1024 * 1024  # safe on v5e/v6e (128 MiB VMEM) and v7x (64 MiB / TC)


# ------------------------------- helpers --------------------------------------
def _round_up(v, m):
    return ((v + m - 1) // m) * m


def _pad_to(a, rows, cols):
    r, c = a.shape
    if r == rows and c == cols:
        return a
    return jnp.pad(a, ((0, rows - r), (0, cols - c)))


def _row_tile(n_pad, row_bytes, vmem_budget=24 * 1024 * 1024):
    """Largest 128-multiple row tile that divides n_pad, leaves >= 2 steps on
    the parallel grid axis (2 TensorCores on v7x) and keeps the double-buffered
    per-row-tile blocks under the VMEM budget."""
    for t in (1024, 512, 256, 128):
        if n_pad % t == 0 and n_pad // t >= 2 and 2 * t * row_bytes <= vmem_budget:
            return t
    return 128


def _red_tile(n_pad):
    """Reduction (adjacency-column) tile: as large as divides the padded dim."""
    for t in (2048, 1024, 512, 256, 128):
        if n_pad % t == 0:
            return t
    return n_pad


# --------------------------- projection kernel --------------------------------
def _proj_kernel(x_ref, w_ref, scale_ref, o_ref):
    """P = diag(d^-1/2) @ (X @ W): Â's column-normalization is folded into the
    projected features so the aggregation can stream raw int8 counts."""
    p = jnp.dot(x_ref[...], w_ref[...], preferred_element_type=jnp.float32)
    o_ref[...] = (p * scale_ref[...]).astype(o_ref.dtype)


def _project(x, w, d_scale):
    n_pad, fin = x.shape
    hid = w.shape[1]
    tm = _row_tile(n_pad, row_bytes=2 * fin + 2 * hid + 4)
    grid = (n_pad // tm,)
    cost = pl.CostEstimate(
        flops=2 * n_pad * fin * hid,
        transcendentals=0,
        bytes_accessed=2 * n_pad * fin + 2 * fin * hid + 4 * n_pad + 2 * n_pad * hid,
    )
    return pl.pallas_call(
        _proj_kernel,
        out_shape=jax.ShapeDtypeStruct((n_pad, hid), jnp.bfloat16),
        grid_spec=pltpu.PrefetchScalarGridSpec(
            num_scalar_prefetch=0,
            grid=grid,
            in_specs=[
                pl.BlockSpec((tm, fin), lambda i: (i, 0)),    # X row tile (bf16)
                pl.BlockSpec((fin, hid), lambda i: (0, 0)),   # W resident (bf16)
                pl.BlockSpec((tm, 1), lambda i: (i, 0)),      # d^-1/2 rows (f32)
            ],
            out_specs=pl.BlockSpec((tm, hid), lambda i: (i, 0)),
        ),
        compiler_params=pltpu.CompilerParams(
            dimension_semantics=("parallel",),
            vmem_limit_bytes=VMEM_LIMIT),
        cost_estimate=cost,
    )(x, w, d_scale)


# --------------------------- aggregation kernel --------------------------------
def _agg_kernel(c_ref, b_ref, scale_ref, bias_ref, *rest, tk, fuse_w2, single_k):
    """One (i, k) step of ACC = C @ B  (C = raw int8 (A + I) counts).

    Epilogue at the last k step:
      plain :  O = d_row * ACC + bias                               (f32)
      fused :  O = d_row * (relu(d_row * ACC + bias) @ W2)          (bf16)
    Both D^-1/2 factors of Â (and, when fused, the next layer's feature
    projection) are applied while the tile is still in VMEM.
    """
    if fuse_w2:
        w2_ref, *rest = rest
    o_ref = rest[0]
    acc_ref = None if single_k else rest[1]

    def finalize(acc):
        scale = scale_ref[...]                                # (tm, 1) f32
        y = acc * scale + bias_ref[...]                       # (tm, W) f32
        if fuse_w2:
            y = jnp.maximum(y, 0.0)
            y = jnp.dot(y.astype(jnp.bfloat16), w2_ref[...],
                        preferred_element_type=jnp.float32) * scale
        o_ref[...] = y.astype(o_ref.dtype)

    k = pl.program_id(1)
    start = pl.multiple_of(k * tk, tk)
    b_blk = b_ref[pl.ds(start, tk), :]                        # resident B, sliced per k
    c_blk = c_ref[...].astype(jnp.float32).astype(jnp.bfloat16)  # exact small ints
    prod = jnp.dot(c_blk, b_blk, preferred_element_type=jnp.float32)

    if single_k:
        finalize(prod)
    else:
        @pl.when(k == 0)
        def _init():
            acc_ref[...] = jnp.zeros_like(acc_ref)

        acc_ref[...] += prod

        @pl.when(k == pl.num_programs(1) - 1)
        def _fin():
            finalize(acc_ref[...])


def _aggregate(counts, b, d_scale, bias, w2=None):
    n_pad = counts.shape[0]
    width = b.shape[1]
    fuse_w2 = w2 is not None
    out_width = w2.shape[1] if fuse_w2 else width
    out_dtype = jnp.bfloat16 if fuse_w2 else jnp.float32

    tk = _red_tile(n_pad)
    tm = _row_tile(n_pad, row_bytes=tk + 4 * width + 4 * out_width + 4)
    grid = (n_pad // tm, n_pad // tk)
    single_k = grid[1] == 1

    in_specs = [
        pl.BlockSpec((tm, tk), lambda i, k: (i, k)),          # int8 counts tile
        pl.BlockSpec((n_pad, width), lambda i, k: (0, 0)),    # B fully resident (1 DMA)
        pl.BlockSpec((tm, 1), lambda i, k: (i, 0)),           # d^-1/2 rows
        pl.BlockSpec((1, bias.shape[1]), lambda i, k: (0, 0)),
    ]
    args = [counts, b, d_scale, bias]
    if fuse_w2:
        in_specs.append(pl.BlockSpec(w2.shape, lambda i, k: (0, 0)))  # W2 resident
        args.append(w2)

    scratch = [] if single_k else [pltpu.VMEM((tm, width), jnp.float32)]

    flops = 2 * n_pad * n_pad * width
    if fuse_w2:
        flops += 2 * n_pad * width * out_width
    bytes_accessed = (n_pad * n_pad                 # int8 counts, read once
                      + 2 * n_pad * width           # resident B, read once
                      + 4 * n_pad + 4 * bias.size
                      + (2 * w2.size if fuse_w2 else 0)
                      + jnp.dtype(out_dtype).itemsize * n_pad * out_width)
    cost = pl.CostEstimate(flops=flops, transcendentals=0,
                           bytes_accessed=bytes_accessed)

    return pl.pallas_call(
        functools.partial(_agg_kernel, tk=tk, fuse_w2=fuse_w2, single_k=single_k),
        out_shape=jax.ShapeDtypeStruct((n_pad, out_width), out_dtype),
        grid_spec=pltpu.PrefetchScalarGridSpec(
            num_scalar_prefetch=0,
            grid=grid,
            in_specs=in_specs,
            out_specs=pl.BlockSpec((tm, out_width), lambda i, k: (i, 0)),
            scratch_shapes=scratch,
        ),
        compiler_params=pltpu.CompilerParams(
            dimension_semantics=("parallel", "arbitrary"),
            vmem_limit_bytes=VMEM_LIMIT),
        cost_estimate=cost,
    )(*args)


# ------------------------------ GCN forward ------------------------------------
@jax.jit
def gcn_encoder_forward(counts_i8, d_inv_sqrt, x, w1, b1, w2, b2):
    """Two-layer GCN forward, equivalent to GCNEncoder.forward / encode.

    counts_i8:  [N_pad, N_pad] int8  raw (A + I) counts (padded, from builder)
    d_inv_sqrt: [N_pad, 1]     f32   D^-1/2 (0 on padded rows)
    x: [N, Fin]; w1: [Fin, 2*out], b1: [1, 2*out]; w2: [2*out, out], b2: [1, out]
    returns [N, out] f32
    """
    n, fin = x.shape
    hidden = w1.shape[1]
    out_channels = w2.shape[1]
    n_pad = counts_i8.shape[0]
    fin_p, hid_p, out_p = (_round_up(v, LANE) for v in (fin, hidden, out_channels))

    x_p = _pad_to(x, n_pad, fin_p).astype(jnp.bfloat16)
    w1_p = _pad_to(w1, fin_p, hid_p).astype(jnp.bfloat16)
    w2_p = _pad_to(w2, hid_p, out_p).astype(jnp.bfloat16)
    b1_p = _pad_to(b1, 1, hid_p).astype(jnp.float32)
    b2_p = _pad_to(b2, 1, out_p).astype(jnp.float32)

    # Layer-1 projection (column D^-1/2 folded into rows of X @ W1).
    p = _project(x_p, w1_p, d_inv_sqrt)                       # bf16 [N_pad, hid_p]
    # Layer-1 aggregation fused with ReLU + layer-2 projection + column D^-1/2.
    g = _aggregate(counts_i8, p, d_inv_sqrt, b1_p, w2=w2_p)   # bf16 [N_pad, out_p]
    # Layer-2 aggregation (row D^-1/2 + bias in the epilogue).
    out = _aggregate(counts_i8, g, d_inv_sqrt, b2_p)          # f32  [N_pad, out_p]
    return out[:n, :out_channels]


# ------------------------------- JAX glue --------------------------------------
def build_graph_operands(edge_index, num_nodes):
    """Padded raw (A+I) counts (int8) + D^-1/2. Hoist: the graph is static.

    Matches torch_geometric gcn_norm / add_remaining_self_loops semantics:
    duplicate edges sum, but every node ends up with exactly one self loop of
    weight 1 (an existing self loop is replaced, not incremented).
    """
    # TODO(synk): the edge_index -> dense scatter-add stays in plain JAX glue.
    n_pad = _round_up(max(num_nodes, LANE), LANE)
    src, dst = edge_index[0], edge_index[1]
    adj = jnp.zeros((n_pad, n_pad), jnp.int32)
    adj = adj.at[dst, src].add(1)                   # aggregate over incoming edges
    diag = jnp.arange(num_nodes)
    adj = adj.at[diag, diag].set(1)                 # add_remaining_self_loops
    deg = jnp.sum(adj, axis=1).astype(jnp.float32)
    d_inv_sqrt = jnp.where(deg > 0, jax.lax.rsqrt(jnp.maximum(deg, 1.0)), 0.0)
    # NOTE: int8 is exact for duplicate-edge multiplicity <= 127 (typical graphs).
    counts = jnp.clip(adj, 0, 127).astype(jnp.int8)
    return counts, d_inv_sqrt.reshape(n_pad, 1)


def glorot(key, shape):
    fan_in, fan_out = shape
    limit = jnp.sqrt(6.0 / (fan_in + fan_out))
    return jax.random.uniform(key, shape, jnp.float32, -limit, limit)


def init_params(key, in_channels, out_channels):
    k1, k2 = jax.random.split(key)
    hidden = 2 * out_channels
    w1 = glorot(k1, (in_channels, hidden))
    b1 = jnp.zeros((1, hidden), jnp.float32)
    w2 = glorot(k2, (hidden, out_channels))
    b2 = jnp.zeros((1, out_channels), jnp.float32)
    return w1, b1, w2, b2


# ------------------------------- demo / test ------------------------------------
if __name__ == "__main__":
    key = jax.random.PRNGKey(0)
    k_x, k_e, k_p = jax.random.split(key, 3)

    num_nodes = 300          # pads to 384: exercises node padding + multi-step reduction
    in_channels = 48
    out_channels = 16        # hidden = 32
    num_edges = 900

    x = jax.random.normal(k_x, (num_nodes, in_channels), jnp.float32)
    edge_index = jax.random.randint(k_e, (2, num_edges), 0, num_nodes, jnp.int32)

    counts_i8, d_inv_sqrt = build_graph_operands(edge_index, num_nodes)
    w1, b1, w2, b2 = init_params(k_p, in_channels, out_channels)

    out = gcn_encoder_forward(counts_i8, d_inv_sqrt, x, w1, b1, w2, b2)
    out = jax.block_until_ready(out)
    assert out.shape == (num_nodes, out_channels)

    # Pure-JAX reference mirroring the kernel's dtype flow (bf16 features,
    # exact integer counts, f32 accumulation and normalization).
    bf16 = jnp.bfloat16
    d = d_inv_sqrt[:num_nodes, 0]
    c = counts_i8[:num_nodes, :num_nodes].astype(bf16)          # exact small ints
    xw = jnp.dot(x.astype(bf16), w1.astype(bf16), preferred_element_type=jnp.float32)
    p_ref = (xw * d[:, None]).astype(bf16)
    h = jnp.maximum(jnp.dot(c, p_ref, preferred_element_type=jnp.float32)
                    * d[:, None] + b1, 0.0)
    hw = jnp.dot(h.astype(bf16), w2.astype(bf16), preferred_element_type=jnp.float32)
    g_ref = (hw * d[:, None]).astype(bf16)
    ref = (jnp.dot(c, g_ref, preferred_element_type=jnp.float32)
           * d[:, None] + b2)

    assert jnp.allclose(out, ref, atol=1e-2, rtol=1e-2), \
        float(jnp.max(jnp.abs(out - ref)))

    print("KERNEL_OK")
</pallas_src>

<mosaic_0001>
module attributes {stable_mosaic.version = 11 : i64} {
  func.func @_proj_kernel(%arg0: i32, %arg1: memref<128x128xbf16, #tpu.memory_space<vmem>>, %arg2: memref<128x128xbf16, #tpu.memory_space<vmem>>, %arg3: memref<128x1xf32, #tpu.memory_space<vmem>>, %arg4: memref<128x128xbf16, #tpu.memory_space<vmem>>) attributes {dimension_semantics = [#tpu.dimension_semantics<parallel>], iteration_bounds = array<i64: 3>, scalar_prefetch = 0 : i64, scratch_operands = 0 : i64, tpu.core_type = #tpu.core_type<tc>, window_params = [{transform_indices = @transform_0, window_bounds = array<i64: 128, 128>}, {pipeline_mode = #tpu.pipeline_mode<synchronous>, transform_indices = @transform_1, window_bounds = array<i64: 128, 128>}, {transform_indices = @transform_2, window_bounds = array<i64: 128, 1>}, {transform_indices = @transform_3, window_bounds = array<i64: 128, 128>}]} {
    %c0 = arith.constant 0 : index
    %c0_0 = arith.constant 0 : index
    %0 = vector.load %arg1[%c0, %c0_0] : memref<128x128xbf16, #tpu.memory_space<vmem>>, vector<128x128xbf16>
    %c0_1 = arith.constant 0 : index
    %c0_2 = arith.constant 0 : index
    %1 = vector.load %arg2[%c0_1, %c0_2] : memref<128x128xbf16, #tpu.memory_space<vmem>>, vector<128x128xbf16>
    %cst = arith.constant dense<0.000000e+00> : vector<128x128xf32>
    %2 = tpu.matmul %0, %1, %cst {dimension_numbers = #tpu.dot_dimension_numbers<[1], [0], [0], [1], [0, 0, 1, 1], [], []>} : vector<128x128xbf16>, vector<128x128xbf16>, vector<128x128xf32> -> vector<128x128xf32>
    %c0_3 = arith.constant 0 : index
    %c0_4 = arith.constant 0 : index
    %3 = vector.load %arg3[%c0_3, %c0_4] : memref<128x1xf32, #tpu.memory_space<vmem>>, vector<128x1xf32>
    %4 = vector.broadcast %3 : vector<128x1xf32> to vector<128x128xf32>
    %5 = arith.mulf %2, %4 : vector<128x128xf32>
    %6 = arith.truncf %5 : vector<128x128xf32> to vector<128x128xbf16>
    %c0_5 = arith.constant 0 : index
    %c0_6 = arith.constant 0 : index
    %7 = vector.load %arg4[%c0_5, %c0_6] : memref<128x128xbf16, #tpu.memory_space<vmem>>, vector<128x128xbf16>
    tpu.vector_store %arg4[%c0_5, %c0_6], %6 {strides = array<i32>} : memref<128x128xbf16, #tpu.memory_space<vmem>>, vector<128x128xbf16>,
    return
  }
  func.func @transform_0(%arg0: i32) -> (i32, i32) {
    %c0_i32 = arith.constant 0 : i32
    %c0_i32_0 = arith.constant 0 : i32
    return %arg0, %c0_i32 : i32, i32
  }
  func.func @transform_1(%arg0: i32) -> (i32, i32) {
    %c0_i32 = arith.constant 0 : i32
    %c0_i32_0 = arith.constant 0 : i32
    %c0_i32_1 = arith.constant 0 : i32
    return %c0_i32, %c0_i32_0 : i32, i32
  }
  func.func @transform_2(%arg0: i32) -> (i32, i32) {
    %c0_i32 = arith.constant 0 : i32
    %c0_i32_0 = arith.constant 0 : i32
    return %arg0, %c0_i32 : i32, i32
  }
  func.func @transform_3(%arg0: i32) -> (i32, i32) {
    %c0_i32 = arith.constant 0 : i32
    %c0_i32_0 = arith.constant 0 : i32
    return %arg0, %c0_i32 : i32, i32
  }
}

module attributes {stable_mosaic.version = 11 : i64} {
  func.func @_agg_kernel(%arg0: i32, %arg1: i32, %arg2: memref<128x128xi8, #tpu.memory_space<vmem>>, %arg3: memref<384x128xbf16, #tpu.memory_space<vmem>>, %arg4: memref<128x1xf32, #tpu.memory_space<vmem>>, %arg5: memref<1x128xf32, #tpu.memory_space<vmem>>, %arg6: memref<128x128xf32, #tpu.memory_space<vmem>>, %arg7: memref<128x128xf32, #tpu.memory_space<vmem>>) attributes {dimension_semantics = [#tpu.dimension_semantics<parallel>, #tpu.dimension_semantics<arbitrary>], iteration_bounds = array<i64: 3, 3>, scalar_prefetch = 0 : i64, scratch_operands = 1 : i64, tpu.core_type = #tpu.core_type<tc>, window_params = [{transform_indices = @transform_0, window_bounds = array<i64: 128, 128>}, {pipeline_mode = #tpu.pipeline_mode<synchronous>, transform_indices = @transform_1, window_bounds = array<i64: 384, 128>}, {transform_indices = @transform_2, window_bounds = array<i64: 128, 1>}, {pipeline_mode = #tpu.pipeline_mode<synchronous>, transform_indices = @transform_3, window_bounds = array<i64: 1, 128>}, {transform_indices = @transform_4, window_bounds = array<i64: 128, 128>}]} {
    %c128_i32 = arith.constant 128 : i32
    %0 = arith.muli %arg1, %c128_i32 : i32
    %1 = tpu.assume_multiple %0, 128 : i32
    %2 = arith.index_cast %1 : i32 to index
    %c0 = arith.constant 0 : index
    %3 = vector.load %arg3[%2, %c0] : memref<384x128xbf16, #tpu.memory_space<vmem>>, vector<128x128xbf16>
    %c0_0 = arith.constant 0 : index
    %c0_1 = arith.constant 0 : index
    %4 = vector.load %arg2[%c0_0, %c0_1] : memref<128x128xi8, #tpu.memory_space<vmem>>, vector<128x128xi8>
    %5 = arith.sitofp %4 : vector<128x128xi8> to vector<128x128xf32>
    %6 = arith.truncf %5 : vector<128x128xf32> to vector<128x128xbf16>
    %cst = arith.constant dense<0.000000e+00> : vector<128x128xf32>
    %7 = tpu.matmul %6, %3, %cst {dimension_numbers = #tpu.dot_dimension_numbers<[1], [0], [0], [1], [0, 0, 1, 1], [], []>} : vector<128x128xbf16>, vector<128x128xbf16>, vector<128x128xf32> -> vector<128x128xf32>
    %c0_i32 = arith.constant 0 : i32
    %8 = arith.cmpi eq, %arg1, %c0_i32 : i32
    %9 = arith.extui %8 : i1 to i32
    %c0_i32_2 = arith.constant 0 : i32
    %10 = arith.cmpi ne, %9, %c0_i32_2 : i32
    scf.if %10 {
      %cst_8 = arith.constant 0.000000e+00 : f32
      %17 = vector.broadcast %cst_8 : f32 to vector<128x128xf32>
      %c0_9 = arith.constant 0 : index
      %c0_10 = arith.constant 0 : index
      %18 = vector.load %arg7[%c0_9, %c0_10] : memref<128x128xf32, #tpu.memory_space<vmem>>, vector<128x128xf32>
      tpu.vector_store %arg7[%c0_9, %c0_10], %17 {strides = array<i32>} : memref<128x128xf32, #tpu.memory_space<vmem>>, vector<128x128xf32>,
    } else {
    }
    %c0_3 = arith.constant 0 : index
    %c0_4 = arith.constant 0 : index
    %11 = vector.load %arg7[%c0_3, %c0_4] : memref<128x128xf32, #tpu.memory_space<vmem>>, vector<128x128xf32>
    %12 = arith.addf %11, %7 : vector<128x128xf32>
    %c0_5 = arith.constant 0 : index
    %c0_6 = arith.constant 0 : index
    %13 = vector.load %arg7[%c0_5, %c0_6] : memref<128x128xf32, #tpu.memory_space<vmem>>, vector<128x128xf32>
    tpu.vector_store %arg7[%c0_5, %c0_6], %12 {strides = array<i32>} : memref<128x128xf32, #tpu.memory_space<vmem>>, vector<128x128xf32>,
    %c2_i32 = arith.constant 2 : i32
    %14 = arith.cmpi eq, %arg1, %c2_i32 : i32
    %15 = arith.extui %14 : i1 to i32
    %c0_i32_7 = arith.constant 0 : i32
    %16 = arith.cmpi ne, %15, %c0_i32_7 : i32
    scf.if %16 {
      %c0_8 = arith.constant 0 : index
      %c0_9 = arith.constant 0 : index
      %17 = vector.load %arg7[%c0_8, %c0_9] : memref<128x128xf32, #tpu.memory_space<vmem>>, vector<128x128xf32>
      %c0_10 = arith.constant 0 : index
      %c0_11 = arith.constant 0 : index
      %18 = vector.load %arg4[%c0_10, %c0_11] : memref<128x1xf32, #tpu.memory_space<vmem>>, vector<128x1xf32>
      %19 = vector.broadcast %18 : vector<128x1xf32> to vector<128x128xf32>
      %20 = arith.mulf %17, %19 : vector<128x128xf32>
      %c0_12 = arith.constant 0 : index
      %c0_13 = arith.constant 0 : index
      %21 = vector.load %arg5[%c0_12, %c0_13] : memref<1x128xf32, #tpu.memory_space<vmem>>, vector<1x128xf32>
      %22 = vector.broadcast %21 : vector<1x128xf32> to vector<128x128xf32>
      %23 = arith.addf %20, %22 : vector<128x128xf32>
      %c0_14 = arith.constant 0 : index
      %c0_15 = arith.constant 0 : index
      %24 = vector.load %arg6[%c0_14, %c0_15] : memref<128x128xf32, #tpu.memory_space<vmem>>, vector<128x128xf32>
      tpu.vector_store %arg6[%c0_14, %c0_15], %23 {strides = array<i32>} : memref<128x128xf32, #tpu.memory_space<vmem>>, vector<128x128xf32>,
    } else {
    }
    return
  }
  func.func @transform_0(%arg0: i32, %arg1: i32) -> (i32, i32) {
    %c0_i32 = arith.constant 0 : i32
    return %arg0, %arg1 : i32, i32
  }
  func.func @transform_1(%arg0: i32, %arg1: i32) -> (i32, i32) {
    %c0_i32 = arith.constant 0 : i32
    %c0_i32_0 = arith.constant 0 : i32
    %c0_i32_1 = arith.constant 0 : i32
    return %c0_i32, %c0_i32_0 : i32, i32
  }
  func.func @transform_2(%arg0: i32, %arg1: i32) -> (i32, i32) {
    %c0_i32 = arith.constant 0 : i32
    %c0_i32_0 = arith.constant 0 : i32
    return %arg0, %c0_i32 : i32, i32
  }
  func.func @transform_3(%arg0: i32, %arg1: i32) -> (i32, i32) {
    %c0_i32 = arith.constant 0 : i32
    %c0_i32_0 = arith.constant 0 : i32
    %c0_i32_1 = arith.constant 0 : i32
    return %c0_i32, %c0_i32_0 : i32, i32
  }
  func.func @transform_4(%arg0: i32, %arg1: i32) -> (i32, i32) {
    %c0_i32 = arith.constant 0 : i32
    %c0_i32_0 = arith.constant 0 : i32
    return %arg0, %c0_i32 : i32, i32
  }
}

module attributes {stable_mosaic.version = 11 : i64} {
  func.func @_agg_kernel(%arg0: i32, %arg1: i32, %arg2: memref<128x128xi8, #tpu.memory_space<vmem>>, %arg3: memref<384x128xbf16, #tpu.memory_space<vmem>>, %arg4: memref<128x1xf32, #tpu.memory_space<vmem>>, %arg5: memref<1x128xf32, #tpu.memory_space<vmem>>, %arg6: memref<128x128xbf16, #tpu.memory_space<vmem>>, %arg7: memref<128x128xbf16, #tpu.memory_space<vmem>>, %arg8: memref<128x128xf32, #tpu.memory_space<vmem>>) attributes {dimension_semantics = [#tpu.dimension_semantics<parallel>, #tpu.dimension_semantics<arbitrary>], iteration_bounds = array<i64: 3, 3>, scalar_prefetch = 0 : i64, scratch_operands = 1 : i64, tpu.core_type = #tpu.core_type<tc>, window_params = [{transform_indices = @transform_0, window_bounds = array<i64: 128, 128>}, {pipeline_mode = #tpu.pipeline_mode<synchronous>, transform_indices = @transform_1, window_bounds = array<i64: 384, 128>}, {transform_indices = @transform_2, window_bounds = array<i64: 128, 1>}, {pipeline_mode = #tpu.pipeline_mode<synchronous>, transform_indices = @transform_3, window_bounds = array<i64: 1, 128>}, {pipeline_mode = #tpu.pipeline_mode<synchronous>, transform_indices = @transform_4, window_bounds = array<i64: 128, 128>}, {transform_indices = @transform_5, window_bounds = array<i64: 128, 128>}]} {
    %c128_i32 = arith.constant 128 : i32
    %0 = arith.muli %arg1, %c128_i32 : i32
    %1 = tpu.assume_multiple %0, 128 : i32
    %2 = arith.index_cast %1 : i32 to index
    %c0 = arith.constant 0 : index
    %3 = vector.load %arg3[%2, %c0] : memref<384x128xbf16, #tpu.memory_space<vmem>>, vector<128x128xbf16>
    %c0_0 = arith.constant 0 : index
    %c0_1 = arith.constant 0 : index
    %4 = vector.load %arg2[%c0_0, %c0_1] : memref<128x128xi8, #tpu.memory_space<vmem>>, vector<128x128xi8>
    %5 = arith.sitofp %4 : vector<128x128xi8> to vector<128x128xf32>
    %6 = arith.truncf %5 : vector<128x128xf32> to vector<128x128xbf16>
    %cst = arith.constant dense<0.000000e+00> : vector<128x128xf32>
    %7 = tpu.matmul %6, %3, %cst {dimension_numbers = #tpu.dot_dimension_numbers<[1], [0], [0], [1], [0, 0, 1, 1], [], []>} : vector<128x128xbf16>, vector<128x128xbf16>, vector<128x128xf32> -> vector<128x128xf32>
    %c0_i32 = arith.constant 0 : i32
    %8 = arith.cmpi eq, %arg1, %c0_i32 : i32
    %9 = arith.extui %8 : i1 to i32
    %c0_i32_2 = arith.constant 0 : i32
    %10 = arith.cmpi ne, %9, %c0_i32_2 : i32
    scf.if %10 {
      %cst_8 = arith.constant 0.000000e+00 : f32
      %17 = vector.broadcast %cst_8 : f32 to vector<128x128xf32>
      %c0_9 = arith.constant 0 : index
      %c0_10 = arith.constant 0 : index
      %18 = vector.load %arg8[%c0_9, %c0_10] : memref<128x128xf32, #tpu.memory_space<vmem>>, vector<128x128xf32>
      tpu.vector_store %arg8[%c0_9, %c0_10], %17 {strides = array<i32>} : memref<128x128xf32, #tpu.memory_space<vmem>>, vector<128x128xf32>,
    } else {
    }
    %c0_3 = arith.constant 0 : index
    %c0_4 = arith.constant 0 : index
    %11 = vector.load %arg8[%c0_3, %c0_4] : memref<128x128xf32, #tpu.memory_space<vmem>>, vector<128x128xf32>
    %12 = arith.addf %11, %7 : vector<128x128xf32>
    %c0_5 = arith.constant 0 : index
    %c0_6 = arith.constant 0 : index
    %13 = vector.load %arg8[%c0_5, %c0_6] : memref<128x128xf32, #tpu.memory_space<vmem>>, vector<128x128xf32>
    tpu.vector_store %arg8[%c0_5, %c0_6], %12 {strides = array<i32>} : memref<128x128xf32, #tpu.memory_space<vmem>>, vector<128x128xf32>,
    %c2_i32 = arith.constant 2 : i32
    %14 = arith.cmpi eq, %arg1, %c2_i32 : i32
    %15 = arith.extui %14 : i1 to i32
    %c0_i32_7 = arith.constant 0 : i32
    %16 = arith.cmpi ne, %15, %c0_i32_7 : i32
    scf.if %16 {
      %c0_8 = arith.constant 0 : index
      %c0_9 = arith.constant 0 : index
      %17 = vector.load %arg8[%c0_8, %c0_9] : memref<128x128xf32, #tpu.memory_space<vmem>>, vector<128x128xf32>
      %c0_10 = arith.constant 0 : index
      %c0_11 = arith.constant 0 : index
      %18 = vector.load %arg4[%c0_10, %c0_11] : memref<128x1xf32, #tpu.memory_space<vmem>>, vector<128x1xf32>
      %19 = vector.broadcast %18 : vector<128x1xf32> to vector<128x128xf32>
      %20 = arith.mulf %17, %19 : vector<128x128xf32>
      %c0_12 = arith.constant 0 : index
      %c0_13 = arith.constant 0 : index
      %21 = vector.load %arg5[%c0_12, %c0_13] : memref<1x128xf32, #tpu.memory_space<vmem>>, vector<1x128xf32>
      %22 = vector.broadcast %21 : vector<1x128xf32> to vector<128x128xf32>
      %23 = arith.addf %20, %22 : vector<128x128xf32>
      %cst_14 = arith.constant 0.000000e+00 : f32
      %24 = vector.broadcast %cst_14 : f32 to vector<128x128xf32>
      %25 = arith.maximumf %23, %24 : vector<128x128xf32>
      %26 = arith.truncf %25 : vector<128x128xf32> to vector<128x128xbf16>
      %c0_15 = arith.constant 0 : index
      %c0_16 = arith.constant 0 : index
      %27 = vector.load %arg6[%c0_15, %c0_16] : memref<128x128xbf16, #tpu.memory_space<vmem>>, vector<128x128xbf16>
      %cst_17 = arith.constant dense<0.000000e+00> : vector<128x128xf32>
      %28 = tpu.matmul %26, %27, %cst_17 {dimension_numbers = #tpu.dot_dimension_numbers<[1], [0], [0], [1], [0, 0, 1, 1], [], []>} : vector<128x128xbf16>, vector<128x128xbf16>, vector<128x128xf32> -> vector<128x128xf32>
      %29 = vector.broadcast %18 : vector<128x1xf32> to vector<128x128xf32>
      %30 = arith.mulf %28, %29 : vector<128x128xf32>
      %31 = arith.truncf %30 : vector<128x128xf32> to vector<128x128xbf16>
      %c0_18 = arith.constant 0 : index
      %c0_19 = arith.constant 0 : index
      %32 = vector.load %arg7[%c0_18, %c0_19] : memref<128x128xbf16, #tpu.memory_space<vmem>>, vector<128x128xbf16>
      tpu.vector_store %arg7[%c0_18, %c0_19], %31 {strides = array<i32>} : memref<128x128xbf16, #tpu.memory_space<vmem>>, vector<128x128xbf16>,
    } else {
    }
    return
  }
  func.func @transform_0(%arg0: i32, %arg1: i32) -> (i32, i32) {
    %c0_i32 = arith.constant 0 : i32
    return %arg0, %arg1 : i32, i32
  }
  func.func @transform_1(%arg0: i32, %arg1: i32) -> (i32, i32) {
    %c0_i32 = arith.constant 0 : i32
    %c0_i32_0 = arith.constant 0 : i32
    %c0_i32_1 = arith.constant 0 : i32
    return %c0_i32, %c0_i32_0 : i32, i32
  }
  func.func @transform_2(%arg0: i32, %arg1: i32) -> (i32, i32) {
    %c0_i32 = arith.constant 0 : i32
    %c0_i32_0 = arith.constant 0 : i32
    return %arg0, %c0_i32 : i32, i32
  }
  func.func @transform_3(%arg0: i32, %arg1: i32) -> (i32, i32) {
    %c0_i32 = arith.constant 0 : i32
    %c0_i32_0 = arith.constant 0 : i32
    %c0_i32_1 = arith.constant 0 : i32
    return %c0_i32, %c0_i32_0 : i32, i32
  }
  func.func @transform_4(%arg0: i32, %arg1: i32) -> (i32, i32) {
    %c0_i32 = arith.constant 0 : i32
    %c0_i32_0 = arith.constant 0 : i32
    %c0_i32_1 = arith.constant 0 : i32
    return %c0_i32, %c0_i32_0 : i32, i32
  }
  func.func @transform_5(%arg0: i32, %arg1: i32) -> (i32, i32) {
    %c0_i32 = arith.constant 0 : i32
    %c0_i32_0 = arith.constant 0 : i32
    return %arg0, %c0_i32 : i32, i32
  }
}

</mosaic_0001>

<bundles_post_ra>
// kernel: gcn_encoder_forward.3
= control target key start
LH: loop header
LB: loop body
LE: loop exit
PB: predicated region body
PF: predicated region fallthrough
CT: control target
= control target key end

     0   :  { %s910_s12 = smov 0   ;;  %s1000_s0 = inlined_call_operand.vmem [shape: bf16[384,128], index: 0, kind: input, shape index: {}]   ;;  %s1001_s1 = inlined_call_operand.vmem [shape: bf16[128,128], index: 1, kind: input, shape index: {}]   ;;  %s1002_s2 = inlined_call_operand.vmem [shape: f32[384,1], index: 2, kind: input, shape index: {}]   ;;  %s1003_s3 = inlined_call_operand.vmem [shape: bf16[384,128], index: 3, kind: output, shape index: {}]  }
   0x1 LB: > { %s682_s13 = sadd.s32 4294967295, %s887_s12   ;;  %p686_p0 = scmp.ge.s32.totalorder %s887_s12, 1  ;;  %s887_s12 = sphi %s910_s12, %s13_s12  }
   0x2   : > { %p149_p1 = scmp.lt.s32.totalorder %s887_s12, 4 }
   0x4   : > { %p150_p2 = pnand %p686_p0, %p149_p1 }
   0x5   : > { %v865_v0 = vld [vmem:[%s1001_s1] sm:$0xff] (!%p150_p2)   ;;  %s687_s16 = sshll.u32 (!%p150_p2), %s682_s13, 4  ;;  %v866_v1 = vld [vmem:[%s1001_s1 + $0x8] sm:$0xff] (!%p150_p2)   ;;  %v867_v2 = vld [vmem:[%s1001_s1 + $0x10] sm:$0xff] (!%p150_p2)   ;;  %v889_v3 = vmov (!%p150_p2), 0  }
   0x6   : > { %153 = sbr.rel (%p150_p2) target bundleno = 266 (0x10a), region = 32  ;;  %p179_p3 = scmp.lt.s32.totalorder (!%p150_p2), %s687_s16, 47  ;;  %806 = vmatprep.subr.bf16.mxu0 (!%p150_p2), %v865_v0  ;;  %838 = vmatprep.subr.bf16.mxu1 (!%p150_p2), %v865_v0  ;;  %v868_v4 = vld [vmem:[%s1001_s1 + $0x18] sm:$0xff] (!%p150_p2)   ;;  %v869_v7 = vld [vmem:[%s1001_s1 + $0x20] sm:$0xff] (!%p150_p2)   ;;  %v870_v8 = vld [vmem:[%s1001_s1 + $0x28] sm:$0xff] (!%p150_p2)  }
   0x7   : > { %807 = vmatpush3.bf16.msra.mxu0 (!%p150_p2), %v865_v0  ;;  %846 = vmatpush3.bf16.msra.mxu1 (!%p150_p2), %v865_v0  ;;  %v871_v13 = vld [vmem:[%s1001_s1 + $0x30] sm:$0xff] (!%p150_p2)   ;;  %v872_v16 = vld [vmem:[%s1001_s1 + $0x38] sm:$0xff] (!%p150_p2)  }
   0x8   : > { %808 = vmatprep.subr.bf16.mxu0 (!%p150_p2), %v866_v1  ;;  %839 = vmatprep.subr.bf16.mxu1 (!%p150_p2), %v866_v1 }
   0x9   : > { %864 = vset.pattern.permute.xlu1 (!%p150_p2), %v889_v3  ;;  %863 = vset.pattern.permute.xlu0 (!%p150_p2), %v889_v3 }
   0xb   : > { %809 = vmatpush3.bf16.msra.mxu0 (!%p150_p2), %v866_v1  ;;  %847 = vmatpush3.bf16.msra.mxu1 (!%p150_p2), %v866_v1 }
   0xc   : > { %810 = vmatprep.subr.bf16.mxu0 (!%p150_p2), %v867_v2  ;;  %840 = vmatprep.subr.bf16.mxu1 (!%p150_p2), %v867_v2 }
   0xd   : > { %s1005_s16 = smov (!%p179_p3, %s687_s16), 47 }
   0xe   : > { %s688_s21 = sshll.u32 %s1005_s16, 2  ;;  %s690_s27 = sshll.u32 %s1005_s16, 3 }
   0xf   : > { %s935_s24 = scalar_lea.vmem %s1000_s0, %s688_s21  ;;  %811 = vmatpush3.bf16.msra.mxu0 %v867_v2  ;;  %848 = vmatpush3.bf16.msra.mxu1 %v867_v2  ;;  %s949_s5 = scalar_lea.vmem %s1002_s2, %s690_s27 }
  0x10   : > { %v873_v5 = vld [vmem:[%s935_s24] sm:$0xff]   ;;  %812 = vmatprep.subr.bf16.mxu0 %v868_v4  ;;  %841 = vmatprep.subr.bf16.mxu1 %v868_v4  ;;  %v424_v9 = vld [vmem:[%s949_s5 + $0x10] sm:$0xff]  ;;  %v425_v11 = vld [vmem:[%s949_s5 + $0x18] sm:$0xff]  ;;  %s987_s15 = scalar_lea.vmem %s1003_s3, %s688_s21 }
  0x11   : > { %v874_v6 = vld [vmem:[%s935_s24 + $0x20] sm:$0xff]   ;;  %822 = vmatprep.mubr.bf16.mxu0 %v873_v5  ;;  %450 = vperm.xlu1 %864, %v424_v9   ;;  %v423_v12 = vld [vmem:[%s949_s5 + $0x8] sm:$0xff]  ;;  %v429_v17 = vld [vmem:[%s949_s5 + $0x38] sm:$0xff] }
  0x12   : > { %830 = vmatprep.mubr.bf16.mxu1 %v874_v6  ;;  %v422_v10 = vld [vmem:[%s949_s5] sm:$0xff]  ;;  %v427_v14 = vld [vmem:[%s949_s5 + $0x28] sm:$0xff]  ;;  %v428_v18 = vld [vmem:[%s949_s5 + $0x30] sm:$0xff] }
  0x13   : > { %813 = vmatpush3.bf16.msra.mxu0 %v868_v4  ;;  %849 = vmatpush3.bf16.msra.mxu1 %v868_v4  ;;  %v426_v15 = vld [vmem:[%s949_s5 + $0x20] sm:$0xff]  ;;  %v875_v19 = vld [vmem:[%s935_s24 + $0x8] sm:$0xff]   ;;  %v877_v23 = vld [vmem:[%s935_s24 + $0x10] sm:$0xff]  }
  0x14   : > { %814 = vmatprep.subr.bf16.mxu0 %v869_v7  ;;  %842 = vmatprep.subr.bf16.mxu1 %v869_v7  ;;  %v876_v20 = vld [vmem:[%s935_s24 + $0x28] sm:$0xff]   ;;  %v430_v22 = vld [vmem:[%s949_s5 + $0x40] sm:$0xff]  ;;  %v878_v24 = vld [vmem:[%s935_s24 + $0x30] sm:$0xff]  }
  0x15   : > { %440 = vperm.xlu0 %863, %v422_v10   ;;  %455 = vperm.xlu1 %864, %v425_v11   ;;  %v431_v21 = vld [vmem:[%s949_s5 + $0x48] sm:$0xff]  ;;  %v433_v25 = vld [vmem:[%s949_s5 + $0x58] sm:$0xff]  ;;  %v432_v26 = vld [vmem:[%s949_s5 + $0x50] sm:$0xff] }
  0x16   : > { %v879_v27 = vld [vmem:[%s935_s24 + $0x18] sm:$0xff]   ;;  %v435_v29 = vld [vmem:[%s949_s5 + $0x68] sm:$0xff]  ;;  %v434_v30 = vld [vmem:[%s949_s5 + $0x60] sm:$0xff] }
  0x17   : > { %815 = vmatpush3.bf16.msra.mxu0 %v869_v7  ;;  %850 = vmatpush3.bf16.msra.mxu1 %v869_v7  ;;  %v880_v28 = vld [vmem:[%s935_s24 + $0x38] sm:$0xff]   ;;  %v436_v32 = vld [vmem:[%s949_s5 + $0x70] sm:$0xff] }
  0x18   : > { %816 = vmatprep.subr.bf16.mxu0 %v870_v8  ;;  %843 = vmatprep.subr.bf16.mxu1 %v870_v8  ;;  %v437_v31 = vld [vmem:[%s949_s5 + $0x78] sm:$0xff] }
  0x19   : > { %445 = vperm.xlu0 %863, %v423_v12   ;;  %465 = vperm.xlu1 %864, %v427_v14  }
  0x1b   : > { %817 = vmatpush3.bf16.msra.mxu0 %v870_v8  ;;  %851 = vmatpush3.bf16.msra.mxu1 %v870_v8 }
  0x1c   : > { %818 = vmatprep.subr.bf16.mxu0 %v871_v13  ;;  %844 = vmatprep.subr.bf16.mxu1 %v871_v13 }
  0x1d   : > { %460 = vperm.xlu0 %863, %v426_v15   ;;  %475 = vperm.xlu1 %864, %v429_v17  }
  0x1f   : > { %819 = vmatpush3.bf16.msra.mxu0 %v871_v13  ;;  %852 = vmatpush3.bf16.msra.mxu1 %v871_v13 }
  0x20   : > { %820 = vmatprep.subr.bf16.mxu0 %v872_v16  ;;  %845 = vmatprep.subr.bf16.mxu1 %v872_v16 }
  0x21   : > { %470 = vperm.xlu0 %863, %v428_v18   ;;  %485 = vperm.xlu1 %864, %v431_v21  }
  0x23   : > { %821 = vmatpush3.bf16.msra.mxu0 %v872_v16  ;;  %853 = vmatpush3.bf16.msra.mxu1 %v872_v16 }
  0x25   : > { %480 = vperm.xlu0 %863, %v430_v22   ;;  %495 = vperm.xlu1 %864, %v433_v25  }
  0x26   : > { %823 = vmatmul.mubr.bf16.vlgmr.msra.gmra.mrb[0].mxu0 %v875_v19  ;;  %831 = vmatmul.mubr.bf16.vlgmr.msra.gmra.mrb[0].mxu1 %v876_v20 }
  0x27   : > { %826 = vmatprep.mubr.bf16.mxu0 %v877_v23  ;;  %834 = vmatprep.mubr.bf16.mxu1 %v878_v24 }
  0x29   : > { %490 = vperm.xlu0 %863, %v432_v26   ;;  %505 = vperm.xlu1 %864, %v435_v29  }
  0x2d   : > { %500 = vperm.xlu0 %863, %v434_v30   ;;  %515 = vperm.xlu1 %864, %v437_v31  }
  0x2e   : > { %827 = vmatmul.mubr.bf16.gmra.mrb[4].mxu0 %v879_v27  ;;  %835 = vmatmul.mubr.bf16.gmra.mrb[4].mxu1 %v880_v28 }
  0x31   : > { %510 = vperm.xlu0 %863, %v436_v32  }
  0x90   : > { %v451_v33 = vpop.permute.xlu1 %450 }
  0x94   : > { %v441_v34 = vpop.permute.xlu0 %440  ;;  %v456_v35 = vpop.permute.xlu1 %455 }
  0x98   : > { %v446_v36 = vpop.permute.xlu0 %445  ;;  %v466_v37 = vpop.permute.xlu1 %465 }
  0x9c   : > { %v461_v38 = vpop.permute.xlu0 %460  ;;  %v476_v39 = vpop.permute.xlu1 %475 }
  0xa0   : > { %v471_v40 = vpop.permute.xlu0 %470  ;;  %v486_v41 = vpop.permute.xlu1 %485 }
  0xa4   : > { %v481_v42 = vpop.permute.xlu0 %480  ;;  %v496_v43 = vpop.permute.xlu1 %495 }
  0xa8   : > { %v491_v44 = vpop.permute.xlu0 %490  ;;  %v506_v45 = vpop.permute.xlu1 %505 }
  0xac   : > { %v501_v46 = vpop.permute.xlu0 %500  ;;  %v516_v3 = vpop.permute.xlu1 %515 }
  0xb0   : > { %v511_v4 = vpop.permute.xlu0 %510 }
  0xf9   : > { %v824_v47 = vpop.f32.mrb[0].mxu0  ;;  %v832_v48 = vpop.f32.mrb[0].mxu1 }
  0xfa   : > { %v359_v49 = vpop.f32.mrb[1].mxu0  ;;  %v391_v50 = vpop.f32.mrb[1].mxu1  ;;  %v520_v53 = vmul.f32 %v824_v47, %v451_v33  ;;  %v528_v54 = vmul.f32 %v832_v48, %v491_v44 }
  0xfb   : > { %v825_v51 = vpop.f32.mrb[2].mxu0  ;;  %v833_v52 = vpop.f32.mrb[2].mxu1  ;;  %v518_v59 = vmul.f32 %v441_v34, %v359_v49  ;;  %v526_v60 = vmul.f32 %v481_v42, %v391_v50 }
  0xfc   : > { %v521_v55 = vmul.f32 %v825_v51, %v456_v35  ;;  %v529_v56 = vmul.f32 %v833_v52, %v496_v43  ;;  %v362_v57 = vpop.f32.mrb[3].mxu0  ;;  %v394_v58 = vpop.f32.mrb[3].mxu1 }
  0xfd   : > { %v519_v61 = vmul.f32 %v446_v36, %v362_v57  ;;  %v527_v62 = vmul.f32 %v486_v41, %v394_v58 }
  0xfe   : > { %v751_v63 = vpack.c.bf16 %v521_v55, %v520_v53  ;;  %v771_v0 = vpack.c.bf16 %v529_v56, %v528_v54 }
  0xff   : > { %v746_v1 = vpack.c.bf16 %v519_v61, %v518_v59  ;;  %v766_v2 = vpack.c.bf16 %v527_v62, %v526_v60 }
 0x100   : > { %783 = vst [vmem:[%s987_s15 + $0x8] sm:$0xff] %v751_v63   ;;  %787 = vst [vmem:[%s987_s15 + $0x28] sm:$0xff] %v771_v0  }
 0x101   : > { %747 = vst [vmem:[%s987_s15] sm:$0xff] %v746_v1   ;;  %786 = vst [vmem:[%s987_s15 + $0x20] sm:$0xff] %v766_v2   ;;  %v828_v5 = vpop.f32.mrb[4].mxu0  ;;  %v836_v6 = vpop.f32.mrb[4].mxu1 }
 0x102   : > { %v375_v7 = vpop.f32.mrb[5].mxu0  ;;  %v407_v8 = vpop.f32.mrb[5].mxu1  ;;  %v524_v11 = vmul.f32 %v828_v5, %v471_v40  ;;  %v532_v12 = vmul.f32 %v836_v6, %v511_v4 }
 0x103   : > { %v829_v9 = vpop.f32.mrb[6].mxu0  ;;  %v837_v10 = vpop.f32.mrb[6].mxu1  ;;  %v522_v17 = vmul.f32 %v461_v38, %v375_v7  ;;  %v530_v18 = vmul.f32 %v501_v46, %v407_v8 }
 0x104   : > { %v525_v13 = vmul.f32 %v829_v9, %v476_v39  ;;  %v533_v14 = vmul.f32 %v837_v10, %v516_v3  ;;  %v378_v15 = vpop.f32.mrb[7].mxu0  ;;  %v410_v16 = vpop.f32.mrb[7].mxu1 }
 0x105   : > { %v523_v19 = vmul.f32 %v466_v37, %v378_v15  ;;  %v531_v20 = vmul.f32 %v506_v45, %v410_v16 }
 0x106   : > { %v761_v21 = vpack.c.bf16 %v525_v13, %v524_v11  ;;  %v781_v22 = vpack.c.bf16 %v533_v14, %v532_v12 }
 0x107   : > { %v756_v23 = vpack.c.bf16 %v523_v19, %v522_v17  ;;  %v776_v24 = vpack.c.bf16 %v531_v20, %v530_v18 }
 0x108   : > { %785 = vst [vmem:[%s987_s15 + $0x18] sm:$0xff] %v761_v21   ;;  %789 = vst [vmem:[%s987_s15 + $0x38] sm:$0xff] %v781_v22  }
 0x109   : > { %784 = vst [vmem:[%s987_s15 + $0x10] sm:$0xff] %v756_v23   ;;  %788 = vst [vmem:[%s987_s15 + $0x30] sm:$0xff] %v776_v24  }
 0x10a PF: > { %s13_s12 = sadd.s32 1, %s887_s12  }
 0x10b   : > { %p10_p4 = scmp.ge.s32.totalorder %s13_s12, 5  }
 0x10d   :  { %12 = sbr.rel (!%p10_p4) target bundleno = 1 (0x1), region = 65 }

// kernel: gcn_encoder_forward.5
= control target key start
LH: loop header
LB: loop body
LE: loop exit
PB: predicated region body
PF: predicated region fallthrough
CT: control target
= control target key end

     0   :  { %s1038_s15 = smov 0   ;;  %s1040_s16 = smov 0   ;;  %s1217_s0 = inlined_call_operand.vmem [shape: s8[384,384], index: 0, kind: input, shape index: {}]   ;;  %s1218_s1 = inlined_call_operand.vmem [shape: bf16[384,128], index: 1, kind: input, shape index: {}]   ;;  %s1219_s2 = inlined_call_operand.vmem [shape: f32[384,1], index: 2, kind: input, shape index: {}]   ;;  %s1220_s3 = inlined_call_operand.vmem [shape: f32[1,128], index: 3, kind: input, shape index: {}]   ;;  %s1221_s4 = inlined_call_operand.vmem [shape: f32[384,128], index: 4, kind: output, shape index: {}]  }
   0x1   :  { %s1042_s17 = smov 0   ;;  %s1044_s18 = smov 0  }
   0x2   :  { %s1046_s19 = smov 0   ;;  %s1048_s20 = smov 0  }
   0x3   :  { %s1050_s21 = smov 0  }
   0x4 LB: > { %s23_s22 = sadd.s32 1, %s1001_s19  ;;  %s26_s23 = sadd.s32 1, %s1005_s20  ;;  %s1009_s21 = sphi %s1050_s21, %s14_s21   ;;  %s1005_s20 = sphi %s1048_s20, %s1227_s20   ;;  %s1001_s19 = sphi %s1046_s19, %s1226_s19   ;;  %s997_s18 = sphi %s1044_s18, %s1225_s18   ;;  %s993_s17 = sphi %s1042_s17, %s1224_s17   ;;  %s989_s16 = sphi %s1040_s16, %s1223_s16   ;;  %s985_s15 = sphi %s1038_s15, %s1222_s15  }
   0x5   : > { %p24_p0 = scmp.ge.s32.totalorder %s23_s22, 3  ;;  %p42_p1 = scmp.ne.s32.totalorder %s989_s16, %s985_s15 }
   0x6   : > { %p43_p2 = scmp.eq.s32.totalorder %s1009_s21, 0  ;;  %s35_s27 = sadd.s32 1, %s989_s16 }
   0x7   : > { %s1229_s22 = smov (%p24_p0, %s23_s22), 0  ;;  %s1231_s23 = smov (!%p24_p0, %s26_s23), %s1005_s20 }
   0x8   : > { %p44_p3 = por %p43_p2, %p42_p1  ;;  %p28_p4 = scmp.ge.s32.totalorder %s1231_s23, 3 }
   0x9   : > { %s31_s24 = ssub.s32 %s1001_s19, %s1229_s22  ;;  %p796_p6 = scmp.ge.s32.totalorder %s1009_s21, 9 }
   0xa   : > { %s1233_s23 = smov (%p28_p4, %s1231_s23), 0 }
   0xb   : > { %s30_s25 = ssub.s32 %s1005_s20, %s1233_s23  ;;  %168 = sbr.rel (%p796_p6) target bundleno = 27 (0x1b), region = 24 }
   0xc   : > { %s32_s26 = sor.u32 %s31_s24, %s30_s25 }
   0xd   : > { %p33_p5 = scmp.eq.s32.totalorder %s32_s26, 0 }
   0xf   : > { %s1089_s28 = scalar_select %p33_p5, %s989_s16, %s35_s27  }
  0x12   : > { %171 = sbr.rel (!%p44_p3) target bundleno = 27 (0x1b), region = 28  ;;  %s173_s29 = sand.u32 (%p44_p3), 1, %s989_s16  }
  0x13   : > { %s886_s30 = smul.u32 (%p44_p3), 12, %s1005_s20  ;;  %s797_s5 = sshll.u32 (%p44_p3), %s173_s29, 5 }
  0x14   : > { %s175_s11 = scalar_lea.vmem (%p44_p3), [#allocation3], %s797_s5 }
  0x15   : > { %s178_s6 = sadd.s32 (%p44_p3), %s1001_s19, %s886_s30 }
  0x16   : > { %s800_s7 = sshll.u32 (%p44_p3), %s178_s6, 3 }
  0x17   : > { %s180_s10 = scalar_lea.vmem (%p44_p3), %s1217_s0, %s800_s7 }
  0x18   : > { %v214_v0 = vld [vmem:[%s180_s10] sm:$0xff] (%p44_p3)  ;;  %v216_v1 = vld [vmem:[%s180_s10 + $0x18] sm:$0xff] (%p44_p3)  ;;  %v218_v2 = vld [vmem:[%s180_s10 + $0x30] sm:$0xff] (%p44_p3) }
  0x19   : > { %215 = vst [vmem:[%s175_s11] sm:$0xff] %v214_v0  ;;  %217 = vst [vmem:[%s175_s11 + $0x8] sm:$0xff] %v216_v1  ;;  %v220_v3 = vld [vmem:[%s180_s10 + $0x48] sm:$0xff] }
  0x1a   : > { %219 = vst [vmem:[%s175_s11 + $0x10] sm:$0xff] %v218_v2  ;;  %221 = vst [vmem:[%s175_s11 + $0x18] sm:$0xff] %v220_v3 }
  0x1b PF: > { %p801_p7 = scmp.ge.s32.totalorder %s1009_s21, 1  ;;  %p235_p8 = scmp.lt.s32.totalorder %s1009_s21, 10 }
  0x1d   : > { %p236_p9 = pnand %p801_p7, %p235_p8 }
  0x1e   : > { %s803_s12 = sshll.u32 (!%p236_p9), %s997_s18, 4  ;;  %s807_s13 = sshll.u32 (!%p236_p9), %s993_s17, 7 }
  0x1f   : > { %239 = sbr.rel (%p236_p9) target bundleno = 460 (0x1cc), region = 70  ;;  %p274_p10 = scmp.lt.s32.totalorder (!%p236_p9), %s803_s12, 47 }
  0x20   : > { %s287_s14 = sshra.s32 (!%p236_p9), %s807_s13, 3  ;;  %s242_s29 = sand.u32 (!%p236_p9), 1, %s985_s15  }
  0x21   : > { %s808_s24 = sshll.u32 (!%p236_p9), %s287_s14, 2  ;;  %s802_s10 = sshll.u32 (!%p236_p9), %s242_s29, 5 }
  0x22   : > { %s1105_s27 = scalar_lea.vmem (!%p236_p9), %s1218_s1, %s808_s24  ;;  %s1122_s15 = scalar_lea.vmem (!%p236_p9), [#allocation3], %s802_s10 }
  0x23   : > { %v945_v4 = vld [vmem:[%s1105_s27] sm:$0xff] (!%p236_p9)   ;;  %v946_v5 = vld [vmem:[%s1105_s27 + $0x8] sm:$0xff] (!%p236_p9)   ;;  %v947_v6 = vld [vmem:[%s1105_s27 + $0x10] sm:$0xff] (!%p236_p9)   ;;  %p817_p11 = scmp.ne.s32.totalorder (!%p236_p9), %s993_s17, 0 }
  0x24   : > { %838 = vmatprep.subr.bf16.mxu0 (!%p236_p9), %v945_v4  ;;  %870 = vmatprep.subr.bf16.mxu1 (!%p236_p9), %v945_v4  ;;  %v948_v7 = vld [vmem:[%s1105_s27 + $0x18] sm:$0xff] (!%p236_p9)   ;;  %v307_v8 = vld [vmem:[%s1122_s15] sm:$0xff] (!%p236_p9)  ;;  %v309_v9 = vld [vmem:[%s1122_s15 + $0x10] sm:$0xff] (!%p236_p9) }
  0x25   : > { %839 = vmatpush3.bf16.msra.mxu0 (!%p236_p9), %v945_v4  ;;  %878 = vmatpush3.bf16.msra.mxu1 (!%p236_p9), %v945_v4  ;;  %v311_v10 = vunpack.c.l.s8.bf16 (!%p236_p9), %v307_v8  ;;  %v315_v11 = vunpack.c.l.s8.bf16 (!%p236_p9), %v309_v9  ;;  %v949_v12 = vld [vmem:[%s1105_s27 + $0x20] sm:$0xff] (!%p236_p9)   ;;  %v950_v13 = vld [vmem:[%s1105_s27 + $0x28] sm:$0xff] (!%p236_p9)   ;;  %v951_v14 = vld [vmem:[%s1105_s27 + $0x30] sm:$0xff] (!%p236_p9)   ;;  %v312_v18 = vunpack.c.h.s8.bf16 (!%p236_p9), %v307_v8  ;;  %v316_v19 = vunpack.c.h.s8.bf16 (!%p236_p9), %v309_v9 }
  0x26   : > { %s1235_s12 = smov (!%p274_p10, %s803_s12), 47  ;;  %840 = vmatprep.subr.bf16.mxu0 %v946_v5  ;;  %871 = vmatprep.subr.bf16.mxu1 %v946_v5  ;;  %v952_v15 = vld [vmem:[%s1105_s27 + $0x38] sm:$0xff]   ;;  %v308_v16 = vld [vmem:[%s1122_s15 + $0x8] sm:$0xff]  ;;  %v1011_v40 = vmov (!%p817_p11), 0.0  }
  0x27   : > { %s804_s30 = sshll.u32 %s1235_s12, 3  ;;  %854 = vmatprep.mubr.bf16.mxu0 %v311_v10  ;;  %862 = vmatprep.mubr.bf16.mxu1 %v315_v11  ;;  %v310_v17 = vld [vmem:[%s1122_s15 + $0x18] sm:$0xff]  ;;  %v313_v20 = vunpack.c.l.s8.bf16 %v308_v16  ;;  %v314_v22 = vunpack.c.h.s8.bf16 %v308_v16  ;;  %468 = vst [vmem:[#allocation2] sm:$0xff] (!%p817_p11), %v1011_v40  ;;  %469 = vst [vmem:[#allocation2 + $0x8] sm:$0xff] (!%p817_p11), %v1011_v40 }
  0x28   : > { %s1112_s18 = scalar_lea.vmem %s1219_s2, %s804_s30  ;;  %s1117_s9 = scalar_lea.vmem %s1221_s4, %s804_s30  ;;  %v317_v21 = vunpack.c.l.s8.bf16 %v310_v17  ;;  %v318_v23 = vunpack.c.h.s8.bf16 %v310_v17  ;;  %470 = vst [vmem:[#allocation2 + $0x10] sm:$0xff] (!%p817_p11), %v1011_v40  ;;  %471 = vst [vmem:[#allocation2 + $0x18] sm:$0xff] (!%p817_p11), %v1011_v40 }
  0x29   : > { %841 = vmatpush3.bf16.msra.mxu0 %v946_v5  ;;  %879 = vmatpush3.bf16.msra.mxu1 %v946_v5  ;;  %472 = vst [vmem:[#allocation2 + $0x20] sm:$0xff] (!%p817_p11), %v1011_v40  ;;  %473 = vst [vmem:[#allocation2 + $0x28] sm:$0xff] (!%p817_p11), %v1011_v40 }
  0x2a   : > { %842 = vmatprep.subr.bf16.mxu0 %v947_v6  ;;  %872 = vmatprep.subr.bf16.mxu1 %v947_v6  ;;  %474 = vst [vmem:[#allocation2 + $0x30] sm:$0xff] (!%p817_p11), %v1011_v40  ;;  %475 = vst [vmem:[#allocation2 + $0x38] sm:$0xff] (!%p817_p11), %v1011_v40 }
  0x2b   : > { %476 = vst [vmem:[#allocation2 + $0x40] sm:$0xff] (!%p817_p11), %v1011_v40  ;;  %477 = vst [vmem:[#allocation2 + $0x48] sm:$0xff] (!%p817_p11), %v1011_v40 }
  0x2c   : > { %478 = vst [vmem:[#allocation2 + $0x50] sm:$0xff] (!%p817_p11), %v1011_v40  ;;  %479 = vst [vmem:[#allocation2 + $0x58] sm:$0xff] (!%p817_p11), %v1011_v40 }
  0x2d   : > { %843 = vmatpush3.bf16.msra.mxu0 %v947_v6  ;;  %880 = vmatpush3.bf16.msra.mxu1 %v947_v6  ;;  %480 = vst [vmem:[#allocation2 + $0x60] sm:$0xff] (!%p817_p11), %v1011_v40  ;;  %481 = vst [vmem:[#allocation2 + $0x68] sm:$0xff] (!%p817_p11), %v1011_v40 }
  0x2e   : > { %844 = vmatprep.subr.bf16.mxu0 %v948_v7  ;;  %873 = vmatprep.subr.bf16.mxu1 %v948_v7  ;;  %482 = vst [vmem:[#allocation2 + $0x70] sm:$0xff] (!%p817_p11), %v1011_v40  ;;  %483 = vst [vmem:[#allocation2 + $0x78] sm:$0xff] (!%p817_p11), %v1011_v40 }
  0x31   : > { %845 = vmatpush3.bf16.msra.mxu0 %v948_v7  ;;  %881 = vmatpush3.bf16.msra.mxu1 %v948_v7 }
  0x32   : > { %846 = vmatprep.subr.bf16.mxu0 %v949_v12  ;;  %874 = vmatprep.subr.bf16.mxu1 %v949_v12 }
  0x35   : > { %847 = vmatpush3.bf16.msra.mxu0 %v949_v12  ;;  %882 = vmatpush3.bf16.msra.mxu1 %v949_v12 }
  0x36   : > { %848 = vmatprep.subr.bf16.mxu0 %v950_v13  ;;  %875 = vmatprep.subr.bf16.mxu1 %v950_v13 }
  0x39   : > { %849 = vmatpush3.bf16.msra.mxu0 %v950_v13  ;;  %883 = vmatpush3.bf16.msra.mxu1 %v950_v13 }
  0x3a   : > { %850 = vmatprep.subr.bf16.mxu0 %v951_v14  ;;  %876 = vmatprep.subr.bf16.mxu1 %v951_v14 }
  0x3d   : > { %851 = vmatpush3.bf16.msra.mxu0 %v951_v14  ;;  %884 = vmatpush3.bf16.msra.mxu1 %v951_v14 }
  0x3e   : > { %852 = vmatprep.subr.bf16.mxu0 %v952_v15  ;;  %877 = vmatprep.subr.bf16.mxu1 %v952_v15 }
  0x41   : > { %853 = vmatpush3.bf16.msra.mxu0 %v952_v15  ;;  %885 = vmatpush3.bf16.msra.mxu1 %v952_v15 }
  0x44   : > { %855 = vmatmul.mubr.bf16.vlgmr.msra.gmra.mrb[0].mxu0 %v312_v18  ;;  %863 = vmatmul.mubr.bf16.vlgmr.msra.gmra.mrb[0].mxu1 %v316_v19 }
  0x45   : > { %858 = vmatprep.mubr.bf16.mxu0 %v313_v20  ;;  %866 = vmatprep.mubr.bf16.mxu1 %v317_v21 }
  0x4c   : > { %859 = vmatmul.mubr.bf16.gmra.mrb[4].mxu0 %v314_v22  ;;  %867 = vmatmul.mubr.bf16.gmra.mrb[4].mxu1 %v318_v23 }
 0x117   : > { %v856_v24 = vpop.f32.mrb[0].mxu0  ;;  %v1132_v25 = vpop.f32.mrb[0].mxu1 }
 0x118   : > { %v401_v26 = vpop.f32.mrb[1].mxu0  ;;  %v433_v27 = vpop.f32.mrb[1].mxu1 }
 0x119   : > { %v857_v28 = vpop.f32.mrb[2].mxu0  ;;  %v865_v29 = vpop.f32.mrb[2].mxu1 }
 0x11a   : > { %v404_v30 = vpop.f32.mrb[3].mxu0  ;;  %v436_v31 = vpop.f32.mrb[3].mxu1 }
 0x11c   : > { %467 = sbr.rel (%p817_p11) target bundleno = 291 (0x123), region = 78 }
 0x11f   : > { %v860_v32 = vpop.f32.mrb[4].mxu0  ;;  %v1134_v33 = vpop.f32.mrb[4].mxu1 }
 0x120   : > { %v417_v34 = vpop.f32.mrb[5].mxu0  ;;  %v449_v35 = vpop.f32.mrb[5].mxu1 }
 0x121   : > { %v861_v36 = vpop.f32.mrb[6].mxu0  ;;  %v1136_v37 = vpop.f32.mrb[6].mxu1 }
 0x122   : > { %v420_v38 = vpop.f32.mrb[7].mxu0  ;;  %v452_v39 = vpop.f32.mrb[7].mxu1 }
 0x123 PF: > { %v484_v41 = vld [vmem:[#allocation2] sm:$0xff]  ;;  %v485_v42 = vld [vmem:[#allocation2 + $0x8] sm:$0xff]  ;;  %v486_v43 = vld [vmem:[#allocation2 + $0x10] sm:$0xff]  ;;  %p818_p12 = scmp.ne.s32.totalorder %s993_s17, 2 }
 0x124   : > { %v500_v44 = vadd.f32 %v484_v41, %v401_v26  ;;  %v501_v45 = vadd.f32 %v485_v42, %v404_v30  ;;  %v502_v46 = vadd.f32 %v856_v24, %v486_v43  ;;  %v487_v47 = vld [vmem:[#allocation2 + $0x18] sm:$0xff]  ;;  %v488_v48 = vld [vmem:[#allocation2 + $0x20] sm:$0xff]  ;;  %v489_v49 = vld [vmem:[#allocation2 + $0x28] sm:$0xff]  ;;  %v1012_v11 = vmov (!%p818_p12), 0  }
 0x125   : > { %v503_v50 = vadd.f32 %v857_v28, %v487_v47  ;;  %v504_v51 = vadd.f32 %v488_v48, %v417_v34  ;;  %v505_v52 = vadd.f32 %v489_v49, %v420_v38  ;;  %v490_v53 = vld [vmem:[#allocation2 + $0x30] sm:$0xff]  ;;  %v491_v54 = vld [vmem:[#allocation2 + $0x38] sm:$0xff]  ;;  %v492_v55 = vld [vmem:[#allocation2 + $0x40] sm:$0xff]  ;;  %954 = vset.pattern.permute.xlu1 (!%p818_p12), %v1012_v11  ;;  %953 = vset.pattern.permute.xlu0 (!%p818_p12), %v1012_v11 }
 0x126   : > { %516 = vst [vmem:[#allocation2] sm:$0xff] %v500_v44  ;;  %517 = vst [vmem:[#allocation2 + $0x8] sm:$0xff] %v501_v45  ;;  %v506_v56 = vadd.f32 %v860_v32, %v490_v53  ;;  %v507_v57 = vadd.f32 %v861_v36, %v491_v54  ;;  %v508_v58 = vadd.f32 %v492_v55, %v433_v27  ;;  %v493_v59 = vld [vmem:[#allocation2 + $0x48] sm:$0xff]  ;;  %v494_v60 = vld [vmem:[#allocation2 + $0x50] sm:$0xff] }
 0x127   : > { %518 = vst [vmem:[#allocation2 + $0x10] sm:$0xff] %v502_v46  ;;  %v495_v61 = vld [vmem:[#allocation2 + $0x58] sm:$0xff]  ;;  %519 = vst [vmem:[#allocation2 + $0x18] sm:$0xff] %v503_v50  ;;  %v509_v62 = vadd.f32 %v493_v59, %v436_v31  ;;  %v510_v63 = vadd.f32 %v1132_v25, %v494_v60  ;;  %v496_v1 = vld [vmem:[#allocation2 + $0x60] sm:$0xff]  ;;  %535 = sbr.rel (%p818_p12) target bundleno = 460 (0x1cc), region = 82 }
 0x128   : > { %520 = vst [vmem:[#allocation2 + $0x20] sm:$0xff] %v504_v51  ;;  %521 = vst [vmem:[#allocation2 + $0x28] sm:$0xff] %v505_v52  ;;  %v511_v0 = vadd.f32 %v865_v29, %v495_v61  ;;  %v497_v2 = vld [vmem:[#allocation2 + $0x68] sm:$0xff]  ;;  %v498_v3 = vld [vmem:[#allocation2 + $0x70] sm:$0xff]  ;;  %v512_v4 = vadd.f32 %v496_v1, %v449_v35 }
 0x129   : > { %522 = vst [vmem:[#allocation2 + $0x30] sm:$0xff] %v506_v56  ;;  %523 = vst [vmem:[#allocation2 + $0x38] sm:$0xff] %v507_v57  ;;  %v513_v5 = vadd.f32 %v497_v2, %v452_v39  ;;  %v514_v6 = vadd.f32 %v1134_v33, %v498_v3  ;;  %v499_v7 = vld [vmem:[#allocation2 + $0x78] sm:$0xff]  ;;  %v554_v9 = vld [vmem:[%s1112_s18 + $0x10] sm:$0xff] (!%p818_p12) }
 0x12a   : > { %524 = vst [vmem:[#allocation2 + $0x40] sm:$0xff] %v508_v58  ;;  %525 = vst [vmem:[#allocation2 + $0x48] sm:$0xff] %v509_v62  ;;  %v515_v8 = vadd.f32 %v1136_v37, %v499_v7  ;;  %v552_v10 = vld [vmem:[%s1112_s18] sm:$0xff] (!%p818_p12)  ;;  %580 = vperm.xlu1 (!%p818_p12), %954, %v554_v9   ;;  %v555_v12 = vld [vmem:[%s1112_s18 + $0x18] sm:$0xff] (!%p818_p12) }
 0x12b   : > { %526 = vst [vmem:[#allocation2 + $0x50] sm:$0xff] %v510_v63  ;;  %527 = vst [vmem:[#allocation2 + $0x58] sm:$0xff] %v511_v0  ;;  %570 = vperm.xlu0 (!%p818_p12), %953, %v552_v10   ;;  %v553_v13 = vld [vmem:[%s1112_s18 + $0x8] sm:$0xff] (!%p818_p12)  ;;  %v556_v15 = vld [vmem:[%s1112_s18 + $0x20] sm:$0xff] (!%p818_p12) }
 0x12c   : > { %528 = vst [vmem:[#allocation2 + $0x60] sm:$0xff] %v512_v4  ;;  %529 = vst [vmem:[#allocation2 + $0x68] sm:$0xff] %v513_v5  ;;  %v557_v14 = vld [vmem:[%s1112_s18 + $0x28] sm:$0xff] (!%p818_p12)  ;;  %v559_v16 = vld [vmem:[%s1112_s18 + $0x38] sm:$0xff] (!%p818_p12) }
 0x12d   : > { %530 = vst [vmem:[#allocation2 + $0x70] sm:$0xff] %v514_v6  ;;  %531 = vst [vmem:[#allocation2 + $0x78] sm:$0xff] %v515_v8  ;;  %v558_v17 = vld [vmem:[%s1112_s18 + $0x30] sm:$0xff] (!%p818_p12)  ;;  %v561_v18 = vld [vmem:[%s1112_s18 + $0x48] sm:$0xff] (!%p818_p12) }
 0x12e   : > { %585 = vperm.xlu1 %954, %v555_v12   ;;  %v560_v19 = vld [vmem:[%s1112_s18 + $0x40] sm:$0xff]  ;;  %v563_v20 = vld [vmem:[%s1112_s18 + $0x58] sm:$0xff]  ;;  %v562_v21 = vld [vmem:[%s1112_s18 + $0x50] sm:$0xff] }
 0x12f   : > { %575 = vperm.xlu0 %953, %v553_v13   ;;  %v565_v22 = vld [vmem:[%s1112_s18 + $0x68] sm:$0xff]  ;;  %v564_v23 = vld [vmem:[%s1112_s18 + $0x60] sm:$0xff]  ;;  %v567_v24 = vld [vmem:[%s1112_s18 + $0x78] sm:$0xff] }
 0x130   : > { %v566_v25 = vld [vmem:[%s1112_s18 + $0x70] sm:$0xff]  ;;  %v536_v27 = vld [vmem:[#allocation2] sm:$0xff]  ;;  %v539_v33 = vld [vmem:[#allocation2 + $0x18] sm:$0xff] }
 0x131   : > { %v538_v26 = vld [vmem:[#allocation2 + $0x10] sm:$0xff]  ;;  %v1162_v28 = vld [vmem:[%s1220_s3] ss:$0 sm:$0xff]  ;;  %v537_v34 = vld [vmem:[#allocation2 + $0x8] sm:$0xff] }
 0x132   : > { %595 = vperm.xlu1 %954, %v557_v14   ;;  %v541_v41 = vld [vmem:[#allocation2 + $0x28] sm:$0xff]  ;;  %v540_v42 = vld [vmem:[#allocation2 + $0x20] sm:$0xff]  ;;  %v543_v49 = vld [vmem:[#allocation2 + $0x38] sm:$0xff] }
 0x133   : > { %590 = vperm.xlu0 %953, %v556_v15   ;;  %v542_v50 = vld [vmem:[#allocation2 + $0x30] sm:$0xff]  ;;  %v545_v57 = vld [vmem:[#allocation2 + $0x48] sm:$0xff]  ;;  %v544_v58 = vld [vmem:[#allocation2 + $0x40] sm:$0xff] }
 0x134   : > { %v547_v1 = vld [vmem:[#allocation2 + $0x58] sm:$0xff]  ;;  %v546_v2 = vld [vmem:[#allocation2 + $0x50] sm:$0xff]  ;;  %v549_v9 = vld [vmem:[#allocation2 + $0x68] sm:$0xff] }
 0x135   : > { %v548_v10 = vld [vmem:[#allocation2 + $0x60] sm:$0xff] }
 0x136   : > { %605 = vperm.xlu1 %954, %v559_v16  }
 0x137   : > { %600 = vperm.xlu0 %953, %v558_v17   ;;  %v551_v17 = vld [vmem:[#allocation2 + $0x78] sm:$0xff] }
 0x13a   : > { %615 = vperm.xlu1 %954, %v561_v18   ;;  %v550_v18 = vld [vmem:[#allocation2 + $0x70] sm:$0xff] }
 0x13b   : > { %610 = vperm.xlu0 %953, %v560_v19  }
 0x13e   : > { %625 = vperm.xlu1 %954, %v563_v20  }
 0x13f   : > { %620 = vperm.xlu0 %953, %v562_v21  }
 0x142   : > { %635 = vperm.xlu1 %954, %v565_v22  }
 0x143   : > { %630 = vperm.xlu0 %953, %v564_v23  }
 0x146   : > { %645 = vperm.xlu1 %954, %v567_v24  }
 0x147   : > { %640 = vperm.xlu0 %953, %v566_v25  }
 0x1a9   : > { %v581_v29 = vpop.permute.xlu1 %580 }
 0x1aa   : > { %v571_v30 = vpop.permute.xlu0 %570  ;;  %v650_v31 = vmul.f32 %v581_v29, %v538_v26 }
 0x1ab   : > { %v648_v32 = vmul.f32 %v571_v30, %v536_v27 }
 0x1ac   : > { %v673_v35 = vadd.f32 %v1162_v28, %v650_v31 }
 0x1ad   : > { %v671_v36 = vadd.f32 %v1162_v28, %v648_v32  ;;  %v586_v37 = vpop.permute.xlu1 %585 }
 0x1ae   : > { %v576_v38 = vpop.permute.xlu0 %575  ;;  %689 = vst [vmem:[%s1117_s9 + $0x10] sm:$0xff] %v673_v35  ;;  %v651_v39 = vmul.f32 %v586_v37, %v539_v33 }
 0x1af   : > { %687 = vst [vmem:[%s1117_s9] sm:$0xff] %v671_v36  ;;  %v649_v40 = vmul.f32 %v576_v38, %v537_v34 }
 0x1b0   : > { %v674_v43 = vadd.f32 %v1162_v28, %v651_v39 }
 0x1b1   : > { %v672_v44 = vadd.f32 %v1162_v28, %v649_v40  ;;  %v596_v45 = vpop.permute.xlu1 %595 }
 0x1b2   : > { %v591_v46 = vpop.permute.xlu0 %590  ;;  %690 = vst [vmem:[%s1117_s9 + $0x18] sm:$0xff] %v674_v43  ;;  %v653_v47 = vmul.f32 %v596_v45, %v541_v41 }
 0x1b3   : > { %688 = vst [vmem:[%s1117_s9 + $0x8] sm:$0xff] %v672_v44  ;;  %v652_v48 = vmul.f32 %v591_v46, %v540_v42 }
 0x1b4   : > { %v676_v51 = vadd.f32 %v1162_v28, %v653_v47 }
 0x1b5   : > { %v675_v52 = vadd.f32 %v1162_v28, %v652_v48  ;;  %v606_v53 = vpop.permute.xlu1 %605 }
 0x1b6   : > { %v601_v54 = vpop.permute.xlu0 %600  ;;  %692 = vst [vmem:[%s1117_s9 + $0x28] sm:$0xff] %v676_v51  ;;  %v655_v55 = vmul.f32 %v606_v53, %v543_v49 }
 0x1b7   : > { %691 = vst [vmem:[%s1117_s9 + $0x20] sm:$0xff] %v675_v52  ;;  %v654_v56 = vmul.f32 %v601_v54, %v542_v50 }
 0x1b8   : > { %v678_v59 = vadd.f32 %v1162_v28, %v655_v55 }
 0x1b9   : > { %v677_v60 = vadd.f32 %v1162_v28, %v654_v56  ;;  %v616_v61 = vpop.permute.xlu1 %615 }
 0x1ba   : > { %v611_v62 = vpop.permute.xlu0 %610  ;;  %694 = vst [vmem:[%s1117_s9 + $0x38] sm:$0xff] %v678_v59  ;;  %v657_v63 = vmul.f32 %v616_v61, %v545_v57 }
 0x1bb   : > { %693 = vst [vmem:[%s1117_s9 + $0x30] sm:$0xff] %v677_v60  ;;  %v656_v0 = vmul.f32 %v611_v62, %v544_v58 }
 0x1bc   : > { %v680_v3 = vadd.f32 %v1162_v28, %v657_v63 }
 0x1bd   : > { %v679_v4 = vadd.f32 %v1162_v28, %v656_v0  ;;  %v626_v5 = vpop.permute.xlu1 %625 }
 0x1be   : > { %v621_v6 = vpop.permute.xlu0 %620  ;;  %696 = vst [vmem:[%s1117_s9 + $0x48] sm:$0xff] %v680_v3  ;;  %v659_v7 = vmul.f32 %v626_v5, %v547_v1 }
 0x1bf   : > { %695 = vst [vmem:[%s1117_s9 + $0x40] sm:$0xff] %v679_v4  ;;  %v658_v8 = vmul.f32 %v621_v6, %v546_v2 }
 0x1c0   : > { %v682_v11 = vadd.f32 %v1162_v28, %v659_v7 }
 0x1c1   : > { %v681_v12 = vadd.f32 %v1162_v28, %v658_v8  ;;  %v636_v13 = vpop.permute.xlu1 %635 }
 0x1c2   : > { %v631_v14 = vpop.permute.xlu0 %630  ;;  %698 = vst [vmem:[%s1117_s9 + $0x58] sm:$0xff] %v682_v11  ;;  %v661_v15 = vmul.f32 %v636_v13, %v549_v9 }
 0x1c3   : > { %697 = vst [vmem:[%s1117_s9 + $0x50] sm:$0xff] %v681_v12  ;;  %v660_v16 = vmul.f32 %v631_v14, %v548_v10 }
 0x1c4   : > { %v684_v19 = vadd.f32 %v1162_v28, %v661_v15 }
 0x1c5   : > { %v683_v20 = vadd.f32 %v1162_v28, %v660_v16  ;;  %v646_v21 = vpop.permute.xlu1 %645 }
 0x1c6   : > { %v641_v22 = vpop.permute.xlu0 %640  ;;  %700 = vst [vmem:[%s1117_s9 + $0x68] sm:$0xff] %v684_v19  ;;  %v663_v23 = vmul.f32 %v646_v21, %v551_v17 }
 0x1c7   : > { %699 = vst [vmem:[%s1117_s9 + $0x60] sm:$0xff] %v683_v20  ;;  %v662_v24 = vmul.f32 %v641_v22, %v550_v18 }
 0x1c8   : > { %v686_v25 = vadd.f32 %v1162_v28, %v663_v23 }
 0x1c9   : > { %v685_v26 = vadd.f32 %v1162_v28, %v662_v24 }
 0x1ca   : > { %702 = vst [vmem:[%s1117_s9 + $0x78] sm:$0xff] %v686_v25 }
 0x1cb   : > { %701 = vst [vmem:[%s1117_s9 + $0x70] sm:$0xff] %v685_v26 }
 0x1cc PF: > { %s14_s21 = sadd.s32 1, %s1009_s21   ;;  %s1222_s15 = smov %s989_s16 }
 0x1cd   : > { %p11_p13 = scmp.ge.s32.totalorder %s14_s21, 11   ;;  %s1223_s16 = smov %s1089_s28 }
 0x1ce   : > { %s1224_s17 = smov %s1001_s19  ;;  %s1225_s18 = smov %s1005_s20 }
 0x1cf   : > { %s1226_s19 = smov %s1229_s22  ;;  %s1227_s20 = smov %s1233_s23 }
 0x1d0   :  { %13 = sbr.rel (!%p11_p13) target bundleno = 4 (0x4), region = 121 }

// kernel: gcn_encoder_forward.4
= control target key start
LH: loop header
LB: loop body
LE: loop exit
PB: predicated region body
PF: predicated region fallthrough
CT: control target
= control target key end

     0   :  { %s1494_s18 = smov 0   ;;  %s1496_s19 = smov 0   ;;  %s1737_s0 = inlined_call_operand.vmem [shape: s8[384,384], index: 0, kind: input, shape index: {}]   ;;  %s1738_s1 = inlined_call_operand.vmem [shape: bf16[384,128], index: 1, kind: input, shape index: {}]   ;;  %s1739_s2 = inlined_call_operand.vmem [shape: f32[384,1], index: 2, kind: input, shape index: {}]   ;;  %s1740_s3 = inlined_call_operand.vmem [shape: f32[1,128], index: 3, kind: input, shape index: {}]   ;;  %s1741_s4 = inlined_call_operand.vmem [shape: bf16[128,128], index: 4, kind: input, shape index: {}]   ;;  %s1742_s5 = inlined_call_operand.vmem [shape: bf16[384,128], index: 5, kind: output, shape index: {}]  }
   0x1   :  { %s1498_s20 = smov 0   ;;  %s1500_s21 = smov 0  }
   0x2   :  { %s1502_s22 = smov 0   ;;  %s1504_s23 = smov 0  }
   0x3   :  { %s1506_s24 = smov 0  }
   0x4 LB: > { %s24_s25 = sadd.s32 1, %s1452_s22  ;;  %s27_s26 = sadd.s32 1, %s1456_s23  ;;  %s1460_s24 = sphi %s1506_s24, %s15_s24   ;;  %s1456_s23 = sphi %s1504_s23, %s1748_s23   ;;  %s1452_s22 = sphi %s1502_s22, %s1747_s22   ;;  %s1448_s21 = sphi %s1500_s21, %s1746_s21   ;;  %s1444_s20 = sphi %s1498_s20, %s1745_s20   ;;  %s1440_s19 = sphi %s1496_s19, %s1744_s19   ;;  %s1436_s18 = sphi %s1494_s18, %s1743_s18  }
   0x5   : > { %p25_p0 = scmp.ge.s32.totalorder %s24_s25, 3  ;;  %p43_p1 = scmp.ne.s32.totalorder %s1440_s19, %s1436_s18 }
   0x6   : > { %p44_p2 = scmp.eq.s32.totalorder %s1460_s24, 0  ;;  %s36_s30 = sadd.s32 1, %s1440_s19 }
   0x7   : > { %s1750_s25 = smov (%p25_p0, %s24_s25), 0  ;;  %s1752_s26 = smov (!%p25_p0, %s27_s26), %s1456_s23 }
   0x8   : > { %p45_p3 = por %p44_p2, %p43_p1  ;;  %p29_p4 = scmp.ge.s32.totalorder %s1752_s26, 3 }
   0x9   : > { %s32_s27 = ssub.s32 %s1452_s22, %s1750_s25  ;;  %p1088_p6 = scmp.ge.s32.totalorder %s1460_s24, 9 }
   0xa   : > { %s1754_s26 = smov (%p29_p4, %s1752_s26), 0 }
   0xb   : > { %s31_s28 = ssub.s32 %s1456_s23, %s1754_s26  ;;  %193 = sbr.rel (%p1088_p6) target bundleno = 27 (0x1b), region = 28 }
   0xc   : > { %s33_s29 = sor.u32 %s32_s27, %s31_s28 }
   0xd   : > { %p34_p5 = scmp.eq.s32.totalorder %s33_s29, 0 }
   0xf   : > { %s1545_s6 = scalar_select %p34_p5, %s1440_s19, %s36_s30  }
  0x12   : > { %196 = sbr.rel (!%p45_p3) target bundleno = 27 (0x1b), region = 32  ;;  %s198_s7 = sand.u32 (%p45_p3), 1, %s1440_s19  }
  0x13   : > { %s1329_s8 = smul.u32 (%p45_p3), 12, %s1456_s23  ;;  %s1089_s9 = sshll.u32 (%p45_p3), %s198_s7, 5 }
  0x14   : > { %s200_s15 = scalar_lea.vmem (%p45_p3), [#allocation3], %s1089_s9 }
  0x15   : > { %s203_s10 = sadd.s32 (%p45_p3), %s1452_s22, %s1329_s8 }
  0x16   : > { %s1092_s11 = sshll.u32 (%p45_p3), %s203_s10, 3 }
  0x17   : > { %s205_s14 = scalar_lea.vmem (%p45_p3), %s1737_s0, %s1092_s11 }
  0x18   : > { %v239_v0 = vld [vmem:[%s205_s14] sm:$0xff] (%p45_p3)  ;;  %v241_v1 = vld [vmem:[%s205_s14 + $0x18] sm:$0xff] (%p45_p3)  ;;  %v243_v2 = vld [vmem:[%s205_s14 + $0x30] sm:$0xff] (%p45_p3) }
  0x19   : > { %240 = vst [vmem:[%s200_s15] sm:$0xff] %v239_v0  ;;  %242 = vst [vmem:[%s200_s15 + $0x8] sm:$0xff] %v241_v1  ;;  %v245_v3 = vld [vmem:[%s205_s14 + $0x48] sm:$0xff] }
  0x1a   : > { %244 = vst [vmem:[%s200_s15 + $0x10] sm:$0xff] %v243_v2  ;;  %246 = vst [vmem:[%s200_s15 + $0x18] sm:$0xff] %v245_v3 }
  0x1b PF: > { %p1093_p7 = scmp.ge.s32.totalorder %s1460_s24, 1  ;;  %p260_p8 = scmp.lt.s32.totalorder %s1460_s24, 10 }
  0x1d   : > { %p261_p9 = pnand %p1093_p7, %p260_p8 }
  0x1e   : > { %s1095_s16 = sshll.u32 (!%p261_p9), %s1448_s21, 4  ;;  %s1099_s17 = sshll.u32 (!%p261_p9), %s1444_s20, 7 }
  0x1f   : > { %264 = sbr.rel (%p261_p9) target bundleno = 683 (0x2ab), region = 74  ;;  %p301_p10 = scmp.lt.s32.totalorder (!%p261_p9), %s1095_s16, 47 }
  0x20   : > { %s314_s27 = sshra.s32 (!%p261_p9), %s1099_s17, 3  ;;  %s267_s8 = sand.u32 (!%p261_p9), 1, %s1436_s18  }
  0x21   : > { %s1100_s28 = sshll.u32 (!%p261_p9), %s314_s27, 2  ;;  %s1094_s17 = sshll.u32 (!%p261_p9), %s267_s8, 5 }
  0x22   : > { %s1561_s7 = scalar_lea.vmem (!%p261_p9), %s1738_s1, %s1100_s28  ;;  %s1577_s18 = scalar_lea.vmem (!%p261_p9), [#allocation3], %s1094_s17 }
  0x23   : > { %v1388_v4 = vld [vmem:[%s1561_s7] sm:$0xff] (!%p261_p9)   ;;  %v1389_v5 = vld [vmem:[%s1561_s7 + $0x8] sm:$0xff] (!%p261_p9)   ;;  %v1390_v6 = vld [vmem:[%s1561_s7 + $0x10] sm:$0xff] (!%p261_p9)   ;;  %p1109_p11 = scmp.ne.s32.totalorder (!%p261_p9), %s1444_s20, 0 }
  0x24   : > { %1233 = vmatprep.subr.bf16.mxu0 (!%p261_p9), %v1388_v4  ;;  %1297 = vmatprep.subr.bf16.mxu1 (!%p261_p9), %v1388_v4  ;;  %v334_v7 = vld [vmem:[%s1577_s18] sm:$0xff] (!%p261_p9)  ;;  %v336_v8 = vld [vmem:[%s1577_s18 + $0x10] sm:$0xff] (!%p261_p9)  ;;  %v1391_v9 = vld [vmem:[%s1561_s7 + $0x18] sm:$0xff] (!%p261_p9)  }
  0x25   : > { %1234 = vmatpush3.bf16.msra.mxu0 (!%p261_p9), %v1388_v4  ;;  %1305 = vmatpush3.bf16.msra.mxu1 (!%p261_p9), %v1388_v4  ;;  %v338_v10 = vunpack.c.l.s8.bf16 (!%p261_p9), %v334_v7  ;;  %v342_v11 = vunpack.c.l.s8.bf16 (!%p261_p9), %v336_v8  ;;  %v1392_v12 = vld [vmem:[%s1561_s7 + $0x20] sm:$0xff] (!%p261_p9)   ;;  %v1393_v13 = vld [vmem:[%s1561_s7 + $0x28] sm:$0xff] (!%p261_p9)   ;;  %v1394_v14 = vld [vmem:[%s1561_s7 + $0x30] sm:$0xff] (!%p261_p9)   ;;  %v339_v18 = vunpack.c.h.s8.bf16 (!%p261_p9), %v334_v7  ;;  %v343_v19 = vunpack.c.h.s8.bf16 (!%p261_p9), %v336_v8 }
  0x26   : > { %s1756_s16 = smov (!%p301_p10, %s1095_s16), 47  ;;  %1235 = vmatprep.subr.bf16.mxu0 %v1389_v5  ;;  %1298 = vmatprep.subr.bf16.mxu1 %v1389_v5  ;;  %v1395_v15 = vld [vmem:[%s1561_s7 + $0x38] sm:$0xff]   ;;  %v335_v16 = vld [vmem:[%s1577_s18 + $0x8] sm:$0xff]  ;;  %v1462_v40 = vmov (!%p1109_p11), 0.0  }
  0x27   : > { %s1096_s9 = sshll.u32 %s1756_s16, 3  ;;  %s1098_s10 = sshll.u32 %s1756_s16, 2  ;;  %1249 = vmatprep.mubr.bf16.mxu0 %v338_v10  ;;  %1257 = vmatprep.mubr.bf16.mxu1 %v342_v11  ;;  %v337_v17 = vld [vmem:[%s1577_s18 + $0x18] sm:$0xff]  ;;  %v340_v20 = vunpack.c.l.s8.bf16 %v335_v16  ;;  %v341_v22 = vunpack.c.h.s8.bf16 %v335_v16  ;;  %495 = vst [vmem:[#allocation2] sm:$0xff] (!%p1109_p11), %v1462_v40  ;;  %496 = vst [vmem:[#allocation2 + $0x8] sm:$0xff] (!%p1109_p11), %v1462_v40 }
  0x28   : > { %s1567_s21 = scalar_lea.vmem %s1739_s2, %s1096_s9  ;;  %s1572_s15 = scalar_lea.vmem %s1742_s5, %s1098_s10  ;;  %v344_v21 = vunpack.c.l.s8.bf16 %v337_v17  ;;  %v345_v23 = vunpack.c.h.s8.bf16 %v337_v17  ;;  %497 = vst [vmem:[#allocation2 + $0x10] sm:$0xff] (!%p1109_p11), %v1462_v40  ;;  %498 = vst [vmem:[#allocation2 + $0x18] sm:$0xff] (!%p1109_p11), %v1462_v40 }
  0x29   : > { %1236 = vmatpush3.bf16.msra.mxu0 %v1389_v5  ;;  %1306 = vmatpush3.bf16.msra.mxu1 %v1389_v5  ;;  %499 = vst [vmem:[#allocation2 + $0x20] sm:$0xff] (!%p1109_p11), %v1462_v40  ;;  %500 = vst [vmem:[#allocation2 + $0x28] sm:$0xff] (!%p1109_p11), %v1462_v40 }
  0x2a   : > { %1237 = vmatprep.subr.bf16.mxu0 %v1390_v6  ;;  %1299 = vmatprep.subr.bf16.mxu1 %v1390_v6  ;;  %501 = vst [vmem:[#allocation2 + $0x30] sm:$0xff] (!%p1109_p11), %v1462_v40  ;;  %502 = vst [vmem:[#allocation2 + $0x38] sm:$0xff] (!%p1109_p11), %v1462_v40 }
  0x2b   : > { %503 = vst [vmem:[#allocation2 + $0x40] sm:$0xff] (!%p1109_p11), %v1462_v40  ;;  %504 = vst [vmem:[#allocation2 + $0x48] sm:$0xff] (!%p1109_p11), %v1462_v40 }
  0x2c   : > { %505 = vst [vmem:[#allocation2 + $0x50] sm:$0xff] (!%p1109_p11), %v1462_v40  ;;  %506 = vst [vmem:[#allocation2 + $0x58] sm:$0xff] (!%p1109_p11), %v1462_v40 }
  0x2d   : > { %1238 = vmatpush3.bf16.msra.mxu0 %v1390_v6  ;;  %1307 = vmatpush3.bf16.msra.mxu1 %v1390_v6  ;;  %507 = vst [vmem:[#allocation2 + $0x60] sm:$0xff] (!%p1109_p11), %v1462_v40  ;;  %508 = vst [vmem:[#allocation2 + $0x68] sm:$0xff] (!%p1109_p11), %v1462_v40 }
  0x2e   : > { %1239 = vmatprep.subr.bf16.mxu0 %v1391_v9  ;;  %1300 = vmatprep.subr.bf16.mxu1 %v1391_v9  ;;  %509 = vst [vmem:[#allocation2 + $0x70] sm:$0xff] (!%p1109_p11), %v1462_v40  ;;  %510 = vst [vmem:[#allocation2 + $0x78] sm:$0xff] (!%p1109_p11), %v1462_v40 }
  0x31   : > { %1240 = vmatpush3.bf16.msra.mxu0 %v1391_v9  ;;  %1308 = vmatpush3.bf16.msra.mxu1 %v1391_v9 }
  0x32   : > { %1241 = vmatprep.subr.bf16.mxu0 %v1392_v12  ;;  %1301 = vmatprep.subr.bf16.mxu1 %v1392_v12 }
  0x35   : > { %1242 = vmatpush3.bf16.msra.mxu0 %v1392_v12  ;;  %1309 = vmatpush3.bf16.msra.mxu1 %v1392_v12 }
  0x36   : > { %1243 = vmatprep.subr.bf16.mxu0 %v1393_v13  ;;  %1302 = vmatprep.subr.bf16.mxu1 %v1393_v13 }
  0x39   : > { %1244 = vmatpush3.bf16.msra.mxu0 %v1393_v13  ;;  %1310 = vmatpush3.bf16.msra.mxu1 %v1393_v13 }
  0x3a   : > { %1245 = vmatprep.subr.bf16.mxu0 %v1394_v14  ;;  %1303 = vmatprep.subr.bf16.mxu1 %v1394_v14 }
  0x3d   : > { %1246 = vmatpush3.bf16.msra.mxu0 %v1394_v14  ;;  %1311 = vmatpush3.bf16.msra.mxu1 %v1394_v14 }
  0x3e   : > { %1247 = vmatprep.subr.bf16.mxu0 %v1395_v15  ;;  %1304 = vmatprep.subr.bf16.mxu1 %v1395_v15 }
  0x41   : > { %1248 = vmatpush3.bf16.msra.mxu0 %v1395_v15  ;;  %1312 = vmatpush3.bf16.msra.mxu1 %v1395_v15 }
  0x44   : > { %1250 = vmatmul.mubr.bf16.vlgmr.msra.gmra.mrb[0].mxu0 %v339_v18  ;;  %1258 = vmatmul.mubr.bf16.vlgmr.msra.gmra.mrb[0].mxu1 %v343_v19 }
  0x45   : > { %1253 = vmatprep.mubr.bf16.mxu0 %v340_v20  ;;  %1261 = vmatprep.mubr.bf16.mxu1 %v344_v21 }
  0x4c   : > { %1254 = vmatmul.mubr.bf16.gmra.mrb[4].mxu0 %v341_v22  ;;  %1262 = vmatmul.mubr.bf16.gmra.mrb[4].mxu1 %v345_v23 }
 0x117   : > { %v1251_v24 = vpop.f32.mrb[0].mxu0  ;;  %v1588_v25 = vpop.f32.mrb[0].mxu1 }
 0x118   : > { %v428_v26 = vpop.f32.mrb[1].mxu0  ;;  %v460_v27 = vpop.f32.mrb[1].mxu1 }
 0x119   : > { %v1252_v28 = vpop.f32.mrb[2].mxu0  ;;  %v1260_v29 = vpop.f32.mrb[2].mxu1 }
 0x11a   : > { %v431_v30 = vpop.f32.mrb[3].mxu0  ;;  %v463_v31 = vpop.f32.mrb[3].mxu1 }
 0x11c   : > { %494 = sbr.rel (%p1109_p11) target bundleno = 291 (0x123), region = 82 }
 0x11f   : > { %v1255_v32 = vpop.f32.mrb[4].mxu0  ;;  %v1590_v33 = vpop.f32.mrb[4].mxu1 }
 0x120   : > { %v444_v34 = vpop.f32.mrb[5].mxu0  ;;  %v476_v35 = vpop.f32.mrb[5].mxu1 }
 0x121   : > { %v1256_v36 = vpop.f32.mrb[6].mxu0  ;;  %v1592_v37 = vpop.f32.mrb[6].mxu1 }
 0x122   : > { %v447_v38 = vpop.f32.mrb[7].mxu0  ;;  %v479_v39 = vpop.f32.mrb[7].mxu1 }
 0x123 PF: > { %v511_v41 = vld [vmem:[#allocation2] sm:$0xff]  ;;  %v512_v42 = vld [vmem:[#allocation2 + $0x8] sm:$0xff]  ;;  %v513_v43 = vld [vmem:[#allocation2 + $0x10] sm:$0xff]  ;;  %p1110_p12 = scmp.ne.s32.totalorder %s1444_s20, 2 }
 0x124   : > { %v527_v44 = vadd.f32 %v511_v41, %v428_v26  ;;  %v528_v45 = vadd.f32 %v512_v42, %v431_v30  ;;  %v529_v46 = vadd.f32 %v1251_v24, %v513_v43  ;;  %v514_v47 = vld [vmem:[#allocation2 + $0x18] sm:$0xff]  ;;  %v515_v48 = vld [vmem:[#allocation2 + $0x20] sm:$0xff]  ;;  %v516_v49 = vld [vmem:[#allocation2 + $0x28] sm:$0xff]  ;;  %v1463_v11 = vmov (!%p1110_p12), 0  }
 0x125   : > { %v530_v50 = vadd.f32 %v1252_v28, %v514_v47  ;;  %v531_v51 = vadd.f32 %v515_v48, %v444_v34  ;;  %v532_v52 = vadd.f32 %v516_v49, %v447_v38  ;;  %v517_v53 = vld [vmem:[#allocation2 + $0x30] sm:$0xff]  ;;  %v518_v54 = vld [vmem:[#allocation2 + $0x38] sm:$0xff]  ;;  %v519_v55 = vld [vmem:[#allocation2 + $0x40] sm:$0xff]  ;;  %1397 = vset.pattern.permute.xlu1 (!%p1110_p12), %v1463_v11  ;;  %1396 = vset.pattern.permute.xlu0 (!%p1110_p12), %v1463_v11 }
 0x126   : > { %543 = vst [vmem:[#allocation2] sm:$0xff] %v527_v44  ;;  %544 = vst [vmem:[#allocation2 + $0x8] sm:$0xff] %v528_v45  ;;  %v533_v56 = vadd.f32 %v1255_v32, %v517_v53  ;;  %v534_v57 = vadd.f32 %v1256_v36, %v518_v54  ;;  %v535_v58 = vadd.f32 %v519_v55, %v460_v27  ;;  %v520_v59 = vld [vmem:[#allocation2 + $0x48] sm:$0xff]  ;;  %v521_v60 = vld [vmem:[#allocation2 + $0x50] sm:$0xff] }
 0x127   : > { %545 = vst [vmem:[#allocation2 + $0x10] sm:$0xff] %v529_v46  ;;  %v522_v61 = vld [vmem:[#allocation2 + $0x58] sm:$0xff]  ;;  %546 = vst [vmem:[#allocation2 + $0x18] sm:$0xff] %v530_v50  ;;  %v536_v62 = vadd.f32 %v520_v59, %v463_v31  ;;  %v537_v63 = vadd.f32 %v1588_v25, %v521_v60  ;;  %v523_v1 = vld [vmem:[#allocation2 + $0x60] sm:$0xff]  ;;  %562 = sbr.rel (%p1110_p12) target bundleno = 683 (0x2ab), region = 86 }
 0x128   : > { %547 = vst [vmem:[#allocation2 + $0x20] sm:$0xff] %v531_v51  ;;  %548 = vst [vmem:[#allocation2 + $0x28] sm:$0xff] %v532_v52  ;;  %v538_v0 = vadd.f32 %v1260_v29, %v522_v61  ;;  %v524_v2 = vld [vmem:[#allocation2 + $0x68] sm:$0xff]  ;;  %v525_v3 = vld [vmem:[#allocation2 + $0x70] sm:$0xff]  ;;  %v539_v4 = vadd.f32 %v523_v1, %v476_v35 }
 0x129   : > { %549 = vst [vmem:[#allocation2 + $0x30] sm:$0xff] %v533_v56  ;;  %550 = vst [vmem:[#allocation2 + $0x38] sm:$0xff] %v534_v57  ;;  %v540_v5 = vadd.f32 %v524_v2, %v479_v39  ;;  %v541_v6 = vadd.f32 %v1590_v33, %v525_v3  ;;  %v526_v7 = vld [vmem:[#allocation2 + $0x78] sm:$0xff]  ;;  %v587_v9 = vld [vmem:[%s1567_s21 + $0x40] sm:$0xff] (!%p1110_p12) }
 0x12a   : > { %551 = vst [vmem:[#allocation2 + $0x40] sm:$0xff] %v535_v58  ;;  %552 = vst [vmem:[#allocation2 + $0x48] sm:$0xff] %v536_v62  ;;  %v542_v8 = vadd.f32 %v1592_v37, %v526_v7  ;;  %v579_v10 = vld [vmem:[%s1567_s21] sm:$0xff] (!%p1110_p12)  ;;  %637 = vperm.xlu1 (!%p1110_p12), %1397, %v587_v9   ;;  %v588_v12 = vld [vmem:[%s1567_s21 + $0x48] sm:$0xff] (!%p1110_p12) }
 0x12b   : > { %553 = vst [vmem:[#allocation2 + $0x50] sm:$0xff] %v537_v63  ;;  %554 = vst [vmem:[#allocation2 + $0x58] sm:$0xff] %v538_v0  ;;  %597 = vperm.xlu0 (!%p1110_p12), %1396, %v579_v10   ;;  %v580_v13 = vld [vmem:[%s1567_s21 + $0x8] sm:$0xff] (!%p1110_p12)  ;;  %v582_v14 = vld [vmem:[%s1567_s21 + $0x18] sm:$0xff] (!%p1110_p12) }
 0x12c   : > { %555 = vst [vmem:[#allocation2 + $0x60] sm:$0xff] %v539_v4  ;;  %556 = vst [vmem:[#allocation2 + $0x68] sm:$0xff] %v540_v5  ;;  %v581_v15 = vld [vmem:[%s1567_s21 + $0x10] sm:$0xff] (!%p1110_p12)  ;;  %v1398_v16 = vld [vmem:[%s1741_s4] sm:$0xff] (!%p1110_p12)  }
 0x12d   : > { %557 = vst [vmem:[#allocation2 + $0x70] sm:$0xff] %v541_v6  ;;  %558 = vst [vmem:[#allocation2 + $0x78] sm:$0xff] %v542_v8  ;;  %v1399_v17 = vld [vmem:[%s1741_s4 + $0x8] sm:$0xff] (!%p1110_p12)   ;;  %1265 = vmatprep.subr.bf16.mxu0 (!%p1110_p12), %v1398_v16  ;;  %1313 = vmatprep.subr.bf16.mxu1 (!%p1110_p12), %v1398_v16  ;;  %v590_v18 = vld [vmem:[%s1567_s21 + $0x58] sm:$0xff] (!%p1110_p12) }
 0x12e   : > { %642 = vperm.xlu1 %1397, %v588_v12   ;;  %1266 = vmatpush3.bf16.msra.mxu0 %v1398_v16  ;;  %v589_v19 = vld [vmem:[%s1567_s21 + $0x50] sm:$0xff]  ;;  %v584_v21 = vld [vmem:[%s1567_s21 + $0x28] sm:$0xff]  ;;  %v583_v22 = vld [vmem:[%s1567_s21 + $0x20] sm:$0xff] }
 0x12f   : > { %602 = vperm.xlu0 %1396, %v580_v13   ;;  %1321 = vmatpush3.bf16.msra.mxu1 %v1398_v16  ;;  %v1400_v20 = vld [vmem:[%s1741_s4 + $0x10] sm:$0xff]   ;;  %v1401_v23 = vld [vmem:[%s1741_s4 + $0x18] sm:$0xff]   ;;  %v592_v24 = vld [vmem:[%s1567_s21 + $0x68] sm:$0xff] }
 0x130   : > { %1267 = vmatprep.subr.bf16.mxu0 %v1399_v17  ;;  %1314 = vmatprep.subr.bf16.mxu1 %v1399_v17  ;;  %v591_v25 = vld [vmem:[%s1567_s21 + $0x60] sm:$0xff]  ;;  %v586_v27 = vld [vmem:[%s1567_s21 + $0x38] sm:$0xff]  ;;  %v585_v28 = vld [vmem:[%s1567_s21 + $0x30] sm:$0xff] }
 0x131   : > { %v1402_v26 = vld [vmem:[%s1741_s4 + $0x20] sm:$0xff]   ;;  %v1403_v29 = vld [vmem:[%s1741_s4 + $0x28] sm:$0xff]   ;;  %v594_v30 = vld [vmem:[%s1567_s21 + $0x78] sm:$0xff] }
 0x132   : > { %612 = vperm.xlu1 %1397, %v582_v14   ;;  %1268 = vmatpush3.bf16.msra.mxu0 %v1399_v17  ;;  %v593_v31 = vld [vmem:[%s1567_s21 + $0x70] sm:$0xff]  ;;  %v1405_v33 = vld [vmem:[%s1741_s4 + $0x38] sm:$0xff]   ;;  %v571_v34 = vld [vmem:[#allocation2 + $0x40] sm:$0xff] }
 0x133   : > { %607 = vperm.xlu0 %1396, %v581_v15   ;;  %1322 = vmatpush3.bf16.msra.mxu1 %v1399_v17  ;;  %v1404_v32 = vld [vmem:[%s1741_s4 + $0x30] sm:$0xff]   ;;  %v563_v35 = vld [vmem:[#allocation2] sm:$0xff]  ;;  %v572_v41 = vld [vmem:[#allocation2 + $0x48] sm:$0xff] }
 0x134   : > { %1269 = vmatprep.subr.bf16.mxu0 %v1400_v20  ;;  %1315 = vmatprep.subr.bf16.mxu1 %v1400_v20  ;;  %v1648_v40 = vld [vmem:[%s1740_s3] ss:$0 sm:$0xff]  ;;  %v564_v42 = vld [vmem:[#allocation2 + $0x8] sm:$0xff]  ;;  %v566_v49 = vld [vmem:[#allocation2 + $0x18] sm:$0xff] }
 0x135   : > { %v565_v50 = vld [vmem:[#allocation2 + $0x10] sm:$0xff]  ;;  %v574_v61 = vld [vmem:[#allocation2 + $0x58] sm:$0xff]  ;;  %v568_v9 = vld [vmem:[#allocation2 + $0x28] sm:$0xff] }
 0x136   : > { %652 = vperm.xlu1 %1397, %v590_v18   ;;  %1270 = vmatpush3.bf16.msra.mxu0 %v1400_v20  ;;  %v573_v62 = vld [vmem:[#allocation2 + $0x50] sm:$0xff]  ;;  %v567_v10 = vld [vmem:[#allocation2 + $0x20] sm:$0xff] }
 0x137   : > { %647 = vperm.xlu0 %1396, %v589_v19   ;;  %1323 = vmatpush3.bf16.msra.mxu1 %v1400_v20  ;;  %v576_v20 = vld [vmem:[#allocation2 + $0x68] sm:$0xff] }
 0x138   : > { %1271 = vmatprep.subr.bf16.mxu0 %v1401_v23  ;;  %1316 = vmatprep.subr.bf16.mxu1 %v1401_v23 }
 0x13a   : > { %622 = vperm.xlu1 %1397, %v584_v21   ;;  %1272 = vmatpush3.bf16.msra.mxu0 %v1401_v23  ;;  %v575_v21 = vld [vmem:[#allocation2 + $0x60] sm:$0xff] }
 0x13b   : > { %617 = vperm.xlu0 %1396, %v583_v22   ;;  %1324 = vmatpush3.bf16.msra.mxu1 %v1401_v23 }
 0x13c   : > { %1273 = vmatprep.subr.bf16.mxu0 %v1402_v26  ;;  %1317 = vmatprep.subr.bf16.mxu1 %v1402_v26 }
 0x13e   : > { %662 = vperm.xlu1 %1397, %v592_v24   ;;  %1274 = vmatpush3.bf16.msra.mxu0 %v1402_v26 }
 0x13f   : > { %657 = vperm.xlu0 %1396, %v591_v25   ;;  %1325 = vmatpush3.bf16.msra.mxu1 %v1402_v26 }
 0x140   : > { %1275 = vmatprep.subr.bf16.mxu0 %v1403_v29  ;;  %1318 = vmatprep.subr.bf16.mxu1 %v1403_v29 }
 0x142   : > { %632 = vperm.xlu1 %1397, %v586_v27   ;;  %1276 = vmatpush3.bf16.msra.mxu0 %v1403_v29 }
 0x143   : > { %627 = vperm.xlu0 %1396, %v585_v28   ;;  %1326 = vmatpush3.bf16.msra.mxu1 %v1403_v29 }
 0x144   : > { %1277 = vmatprep.subr.bf16.mxu0 %v1404_v32  ;;  %1319 = vmatprep.subr.bf16.mxu1 %v1404_v32 }
 0x146   : > { %672 = vperm.xlu1 %1397, %v594_v30   ;;  %1278 = vmatpush3.bf16.msra.mxu0 %v1404_v32 }
 0x147   : > { %667 = vperm.xlu0 %1396, %v593_v31   ;;  %1327 = vmatpush3.bf16.msra.mxu1 %v1404_v32  ;;  %v570_v31 = vld [vmem:[#allocation2 + $0x38] sm:$0xff]  ;;  %v569_v32 = vld [vmem:[#allocation2 + $0x30] sm:$0xff] }
 0x148   : > { %1279 = vmatprep.subr.bf16.mxu0 %v1405_v33  ;;  %1320 = vmatprep.subr.bf16.mxu1 %v1405_v33 }
 0x14a   : > { %1280 = vmatpush3.bf16.msra.mxu0 %v1405_v33 }
 0x14b   : > { %1328 = vmatpush3.bf16.msra.mxu1 %v1405_v33 }
 0x1a9   : > { %v1639_v36 = vpop.permute.xlu1 %637 }
 0x1aa   : > { %v1641_v37 = vpop.permute.xlu0 %597  ;;  %v683_v38 = vmul.f32 %v1639_v36, %v571_v34 }
 0x1ab   : > { %v675_v39 = vmul.f32 %v1641_v37, %v563_v35 }
 0x1ac   : > { %v706_v46 = vadd.f32 %v1648_v40, %v683_v38 }
 0x1ad   : > { %v1650_v43 = vpop.permute.xlu1 %642  ;;  %v698_v45 = vadd.f32 %v1648_v40, %v675_v39 }
 0x1ae   : > { %v1652_v44 = vpop.permute.xlu0 %602  ;;  %v684_v47 = vmul.f32 %v1650_v43, %v572_v41  ;;  %v722_v56 = vmax.f32 %v706_v46, 0.0 }
 0x1af   : > { %v676_v48 = vmul.f32 %v1652_v44, %v564_v42  ;;  %v714_v55 = vmax.f32 %v698_v45, 0.0 }
 0x1b0   : > { %v707_v52 = vadd.f32 %v1648_v40, %v684_v47  ;;  %v578_v47 = vld [vmem:[#allocation2 + $0x78] sm:$0xff] }
 0x1b1   : > { %v699_v51 = vadd.f32 %v1648_v40, %v676_v48  ;;  %v1660_v53 = vpop.permute.xlu1 %612  ;;  %v577_v48 = vld [vmem:[#allocation2 + $0x70] sm:$0xff] }
 0x1b2   : > { %v1662_v54 = vpop.permute.xlu0 %607  ;;  %v678_v57 = vmul.f32 %v1660_v53, %v566_v49  ;;  %v723_v60 = vmax.f32 %v707_v52, 0.0 }
 0x1b3   : > { %v677_v58 = vmul.f32 %v1662_v54, %v565_v50  ;;  %v715_v59 = vmax.f32 %v699_v51, 0.0 }
 0x1b4   : > { %v701_v63 = vadd.f32 %v1648_v40, %v678_v57  ;;  %v734_v2 = vpack.c.bf16 %v723_v60, %v722_v56 }
 0x1b5   : > { %v700_v0 = vadd.f32 %v1648_v40, %v677_v58  ;;  %v730_v1 = vpack.c.bf16 %v715_v59, %v714_v55  ;;  %v1668_v3 = vpop.permute.xlu1 %652 }
 0x1b6   : > { %v1670_v4 = vpop.permute.xlu0 %647  ;;  %v717_v5 = vmax.f32 %v701_v63, 0.0  ;;  %v686_v7 = vmul.f32 %v1668_v3, %v574_v61  ;;  %1289 = vmatprep.mubr.bf16.mxu1 %v734_v2 }
 0x1b7   : > { %v716_v6 = vmax.f32 %v700_v0, 0.0  ;;  %v685_v8 = vmul.f32 %v1670_v4, %v573_v62  ;;  %1281 = vmatprep.mubr.bf16.mxu0 %v730_v1 }
 0x1b8   : > { %v709_v11 = vadd.f32 %v1648_v40, %v686_v7 }
 0x1b9   : > { %v708_v12 = vadd.f32 %v1648_v40, %v685_v8  ;;  %v731_v13 = vpack.c.bf16 %v717_v5, %v716_v6  ;;  %v1676_v14 = vpop.permute.xlu1 %622 }
 0x1ba   : > { %v1678_v15 = vpop.permute.xlu0 %617  ;;  %v725_v16 = vmax.f32 %v709_v11, 0.0  ;;  %v680_v18 = vmul.f32 %v1676_v14, %v568_v9 }
 0x1bb   : > { %v724_v17 = vmax.f32 %v708_v12, 0.0  ;;  %v679_v19 = vmul.f32 %v1678_v15, %v567_v10  ;;  %1282 = vmatmul.mubr.bf16.vlgmr.msra.gmra.mrb[0].mxu0 %v731_v13 }
 0x1bc   : > { %v703_v22 = vadd.f32 %v1648_v40, %v680_v18 }
 0x1bd   : > { %v702_v23 = vadd.f32 %v1648_v40, %v679_v19  ;;  %v735_v24 = vpack.c.bf16 %v725_v16, %v724_v17  ;;  %v1684_v25 = vpop.permute.xlu1 %662 }
 0x1be   : > { %v1686_v26 = vpop.permute.xlu0 %657  ;;  %v719_v27 = vmax.f32 %v703_v22, 0.0  ;;  %v688_v29 = vmul.f32 %v1684_v25, %v576_v20 }
 0x1bf   : > { %v718_v28 = vmax.f32 %v702_v23, 0.0  ;;  %v687_v30 = vmul.f32 %v1686_v26, %v575_v21  ;;  %1290 = vmatmul.mubr.bf16.vlgmr.msra.gmra.mrb[0].mxu1 %v735_v24 }
 0x1c0   : > { %v711_v33 = vadd.f32 %v1648_v40, %v688_v29 }
 0x1c1   : > { %v710_v34 = vadd.f32 %v1648_v40, %v687_v30  ;;  %v732_v35 = vpack.c.bf16 %v719_v27, %v718_v28  ;;  %v633_v38 = vpop.permute.xlu1 %632 }
 0x1c2   : > { %v628_v39 = vpop.permute.xlu0 %627  ;;  %v727_v41 = vmax.f32 %v711_v33, 0.0  ;;  %v682_v45 = vmul.f32 %v633_v38, %v570_v31 }
 0x1c3   : > { %v726_v42 = vmax.f32 %v710_v34, 0.0  ;;  %v681_v46 = vmul.f32 %v628_v39, %v569_v32  ;;  %1285 = vmatprep.mubr.bf16.mxu0 %v732_v35 }
 0x1c4   : > { %v705_v49 = vadd.f32 %v1648_v40, %v682_v45 }
 0x1c5   : > { %v704_v50 = vadd.f32 %v1648_v40, %v681_v46  ;;  %v736_v51 = vpack.c.bf16 %v727_v41, %v726_v42  ;;  %v673_v52 = vpop.permute.xlu1 %672 }
 0x1c6   : > { %v668_v55 = vpop.permute.xlu0 %667  ;;  %v721_v56 = vmax.f32 %v705_v49, 0.0  ;;  %v690_v58 = vmul.f32 %v673_v52, %v578_v47 }
 0x1c7   : > { %v720_v57 = vmax.f32 %v704_v50, 0.0  ;;  %v689_v59 = vmul.f32 %v668_v55, %v577_v48  ;;  %1293 = vmatprep.mubr.bf16.mxu1 %v736_v51 }
 0x1c8   : > { %v713_v60 = vadd.f32 %v1648_v40, %v690_v58 }
 0x1c9   : > { %v712_v61 = vadd.f32 %v1648_v40, %v689_v59  ;;  %v733_v62 = vpack.c.bf16 %v721_v56, %v720_v57 }
 0x1ca   : > { %v729_v63 = vmax.f32 %v713_v60, 0.0 }
 0x1cb   : > { %v728_v0 = vmax.f32 %v712_v61, 0.0  ;;  %1286 = vmatmul.mubr.bf16.gmra.mrb[4].mxu0 %v733_v62 }
 0x1cd   : > { %v737_v1 = vpack.c.bf16 %v729_v63, %v728_v0 }
 0x1cf   : > { %1294 = vmatmul.mubr.bf16.gmra.mrb[4].mxu1 %v737_v1 }
 0x28e   : > { %v1283_v2 = vpop.f32.mrb[0].mxu0 }
 0x28f   : > { %v836_v5 = vpop.f32.mrb[1].mxu0  ;;  %v901_v7 = vmul.f32 %v1283_v2, %v1662_v54 }
 0x290   : > { %v1284_v6 = vpop.f32.mrb[2].mxu0  ;;  %v899_v10 = vmul.f32 %v836_v5, %v1641_v37 }
 0x291   : > { %v902_v8 = vmul.f32 %v1284_v6, %v1660_v53  ;;  %v839_v9 = vpop.f32.mrb[3].mxu0 }
 0x292   : > { %v900_v40 = vmul.f32 %v839_v9, %v1652_v44  ;;  %v1291_v11 = vpop.f32.mrb[0].mxu1 }
 0x293   : > { %v1162_v12 = vpack.c.bf16 %v902_v8, %v901_v7  ;;  %v868_v13 = vpop.f32.mrb[1].mxu1  ;;  %v909_v18 = vmul.f32 %v1291_v11, %v1670_v4 }
 0x294   : > { %v1157_v16 = vpack.c.bf16 %v900_v40, %v899_v10  ;;  %v1292_v17 = vpop.f32.mrb[2].mxu1  ;;  %v907_v53 = vmul.f32 %v868_v13, %v1639_v36 }
 0x295   : > { %1194 = vst [vmem:[%s1572_s15 + $0x8] sm:$0xff] %v1162_v12   ;;  %v910_v19 = vmul.f32 %v1292_v17, %v1668_v3  ;;  %v871_v54 = vpop.f32.mrb[3].mxu1 }
 0x296   : > { %1158 = vst [vmem:[%s1572_s15] sm:$0xff] %v1157_v16   ;;  %v908_v37 = vmul.f32 %v871_v54, %v1650_v43 }
 0x297   : > { %v1182_v20 = vpack.c.bf16 %v910_v19, %v909_v18 }
 0x298   : > { %v1177_v21 = vpack.c.bf16 %v908_v37, %v907_v53 }
 0x299   : > { %1198 = vst [vmem:[%s1572_s15 + $0x28] sm:$0xff] %v1182_v20  }
 0x29a   : > { %1197 = vst [vmem:[%s1572_s15 + $0x20] sm:$0xff] %v1177_v21  }
 0x29e   : > { %v1287_v44 = vpop.f32.mrb[4].mxu0 }
 0x29f   : > { %v852_v22 = vpop.f32.mrb[5].mxu0  ;;  %v905_v24 = vmul.f32 %v1287_v44, %v628_v39 }
 0x2a0   : > { %v1288_v23 = vpop.f32.mrb[6].mxu0  ;;  %v903_v3 = vmul.f32 %v852_v22, %v1678_v15 }
 0x2a1   : > { %v906_v27 = vmul.f32 %v1288_v23, %v633_v38  ;;  %v855_v4 = vpop.f32.mrb[7].mxu0 }
 0x2a2   : > { %v904_v28 = vmul.f32 %v855_v4, %v1676_v14  ;;  %v1295_v36 = vpop.f32.mrb[4].mxu1 }
 0x2a3   : > { %v1172_v43 = vpack.c.bf16 %v906_v27, %v905_v24  ;;  %v884_v29 = vpop.f32.mrb[5].mxu1  ;;  %v913_v32 = vmul.f32 %v1295_v36, %v668_v55 }
 0x2a4   : > { %v1167_v30 = vpack.c.bf16 %v904_v28, %v903_v3  ;;  %v1296_v31 = vpop.f32.mrb[6].mxu1  ;;  %v911_v35 = vmul.f32 %v884_v29, %v1686_v26 }
 0x2a5   : > { %1196 = vst [vmem:[%s1572_s15 + $0x18] sm:$0xff] %v1172_v43   ;;  %v914_v33 = vmul.f32 %v1296_v31, %v673_v52  ;;  %v887_v34 = vpop.f32.mrb[7].mxu1 }
 0x2a6   : > { %1195 = vst [vmem:[%s1572_s15 + $0x10] sm:$0xff] %v1167_v30   ;;  %v912_v38 = vmul.f32 %v887_v34, %v1684_v25 }
 0x2a7   : > { %v1192_v39 = vpack.c.bf16 %v914_v33, %v913_v32 }
 0x2a8   : > { %v1187_v15 = vpack.c.bf16 %v912_v38, %v911_v35 }
 0x2a9   : > { %1200 = vst [vmem:[%s1572_s15 + $0x38] sm:$0xff] %v1192_v39  }
 0x2aa   : > { %1199 = vst [vmem:[%s1572_s15 + $0x30] sm:$0xff] %v1187_v15  }
 0x2ab PF: > { %s15_s24 = sadd.s32 1, %s1460_s24   ;;  %s1743_s18 = smov %s1440_s19 }
 0x2ac   : > { %p12_p13 = scmp.ge.s32.totalorder %s15_s24, 11   ;;  %s1744_s19 = smov %s1545_s6 }
 0x2ad   : > { %s1745_s20 = smov %s1452_s22  ;;  %s1746_s21 = smov %s1456_s23 }
 0x2ae   : > { %s1747_s22 = smov %s1750_s25  ;;  %s1748_s23 = smov %s1754_s26 }
 0x2af   :  { %14 = sbr.rel (!%p12_p13) target bundleno = 4 (0x4), region = 125 }

</bundles_post_ra>
